<compile_context>
chip_gen: v5e
topology: v5e:2x2
jax: 0.10.0
libtpu: 0.0.40
codegen_flags: <defaults>
</compile_context>

<pallas_src>
import functools
import math

import jax
import jax.numpy as jnp
from jax.experimental import pallas as pl
from jax.experimental.pallas import tpu as pltpu


def _attention_kernel(x_ref, kv_ref, mask_ref, wq_ref, wk_ref, wv_ref, bias_ref,
                      out_ref, kh_ref, vh_ref, *,
                      num_heads, head_dim, compute_dtype, exp_dtype):
    """One (batch, q-tile) grid step of BertSelfAttention.

    x_ref    : (tq, Hq)   f32 query-side activations (one q tile)
    kv_ref   : (Skv, E)   f32 key/value-side activations (full sequence)
    mask_ref : (1, Skv)   f32 additive attention mask
    w*_ref   : bf16 pre-transposed Linear weights, (in_features, H)
    bias_ref : (8, H)     f32 packed rows [bq, bk, bv, pad x 5]
    kh_ref/vh_ref : (nh, Skv, hd) bf16 VMEM scratch (per-batch K/V cache)
    """
    cd = compute_dtype
    f32 = jnp.float32
    skv = kv_ref.shape[0]
    tq = x_ref.shape[0]
    bias = bias_ref[...]

    # ---- K/V projections: once per batch element. The q-tile axis is the
    # inner "arbitrary" grid axis, so qt == 0 runs first for each batch
    # element and fills the persistent scratch used by all its q tiles. ----
    @pl.when(pl.program_id(1) == 0)
    def _project_kv():
        kvc = kv_ref[...].astype(cd)                                     # (Skv, E)
        k = jnp.dot(kvc, wk_ref[...], preferred_element_type=f32) + bias[1:2]
        v = jnp.dot(kvc, wv_ref[...], preferred_element_type=f32) + bias[2:3]
        # Head split = one reshape + one lane-aware transpose per tensor
        # (replaces the old per-head slice/stack copies).
        kh = pltpu.einshape("khd->hkd", k.reshape(skv, num_heads, head_dim))
        vh = pltpu.einshape("khd->hkd", v.reshape(skv, num_heads, head_dim))
        kh_ref[...] = kh.astype(cd)
        vh_ref[...] = vh.astype(cd)

    # ---- Q projection for this query tile; 1/sqrt(head_dim) folded in once.
    q = jnp.dot(x_ref[...].astype(cd), wq_ref[...],
                preferred_element_type=f32) + bias[0:1]
    q = q * (1.0 / math.sqrt(head_dim))
    qh = pltpu.einshape("qhd->hqd", q.reshape(tq, num_heads, head_dim)).astype(cd)

    # ---- Head-batched attention (same einsum pattern as the flash kernel).
    scores = jnp.einsum("hqd,hkd->hqk", qh, kh_ref[...],
                        preferred_element_type=f32)                      # (nh,tq,Skv)
    # clamp_inf is a no-op for f32/bf16. The mask broadcast is hoisted: it is
    # built exactly once per kernel invocation (no inner loop re-broadcast).
    scores = scores + mask_ref[...][jnp.newaxis]                         # (1,1,Skv)
    scores = scores - jnp.max(scores, axis=-1, keepdims=True)
    # exp_dtype=bf16 halves the softmax footprint on v6e/v7x; keep f32 on v5e.
    p = jnp.exp(scores.astype(exp_dtype))
    denom = jnp.sum(p, axis=-1, keepdims=True, dtype=f32)                # (nh,tq,1)

    # Dropout(attention_probs) is identity in eval mode.
    ctx_h = jnp.einsum("hqk,hkd->hqd", p.astype(cd), vh_ref[...],
                       preferred_element_type=f32)                       # (nh,tq,hd)
    # Normalize after the PV matmul (hd << Skv elements/row) on the EUP.
    ctx_h = ctx_h * pl.reciprocal(denom, approx=True)

    # Merge heads: inverse transpose + reshape back to (tq, H).
    ctx = pltpu.einshape("hqd->qhd", ctx_h).reshape(tq, num_heads * head_dim)
    out_ref[...] = ctx.astype(out_ref.dtype)


def _build_attention_call(B, S, Hq, Skv, E, H, tq, num_heads, head_dim,
                          compute_dtype, exp_dtype, out_dtype,
                          vmem_limit_bytes, weight_buffer_count):
    kernel = functools.partial(
        _attention_kernel, num_heads=num_heads, head_dim=head_dim,
        compute_dtype=compute_dtype, exp_dtype=exp_dtype)

    def wspec(shape):
        # Resident weight tile: constant index map => never re-fetched across
        # grid steps; single buffering avoids doubling the weight VMEM.
        if weight_buffer_count is None:
            return pl.BlockSpec(shape, lambda b, qt: (0, 0))
        return pl.BlockSpec(shape, lambda b, qt: (0, 0),
                            pipeline_mode=pl.Buffered(weight_buffer_count))

    return pl.pallas_call(
        kernel,
        out_shape=jax.ShapeDtypeStruct((B, S, H), out_dtype),
        grid=(B, S // tq),
        in_specs=[
            pl.BlockSpec((None, tq, Hq), lambda b, qt: (b, qt, 0)),   # q-side tile
            pl.BlockSpec((None, Skv, E), lambda b, qt: (b, 0, 0)),    # kv-side (full)
            pl.BlockSpec((None, 1, Skv), lambda b, qt: (b, 0, 0)),    # additive mask
            wspec((Hq, H)),                                           # wq
            wspec((E, H)),                                            # wk
            wspec((E, H)),                                            # wv
            wspec((8, H)),                                            # packed biases
        ],
        out_specs=pl.BlockSpec((None, tq, H), lambda b, qt: (b, qt, 0)),
        scratch_shapes=[
            pltpu.VMEM((num_heads, Skv, head_dim), compute_dtype),    # K heads cache
            pltpu.VMEM((num_heads, Skv, head_dim), compute_dtype),    # V heads cache
        ],
        compiler_params=pltpu.CompilerParams(
            # batch axis parallel (megacore / dual-TC); q-tile axis arbitrary
            # because the K/V scratch is filled at qt == 0 and reused.
            dimension_semantics=("parallel", "arbitrary"),
            vmem_limit_bytes=vmem_limit_bytes),
    )


def bert_self_attention(hidden_states, attention_mask=None,
                        encoder_hidden_states=None, encoder_attention_mask=None,
                        *, params, num_heads, q_block=None,
                        compute_dtype=jnp.bfloat16, exp_dtype=jnp.float32,
                        out_dtype=None, vmem_limit_bytes=48 * 1024 * 1024):
    """Mirrors BertSelfAttention.forward; returns context_layer (B, S, H)."""
    is_cross = encoder_hidden_states is not None
    kv = encoder_hidden_states if is_cross else hidden_states
    mask = encoder_attention_mask if is_cross else attention_mask

    B, S, Hq = hidden_states.shape
    _, Skv, E = kv.shape
    H = params["wq"].shape[1]
    head_dim = H // num_heads
    out_dtype = out_dtype or hidden_states.dtype

    if mask is None:
        mask = jnp.zeros((B, 1, Skv), jnp.float32)
    # Accept (B, 1, Skv) or the BERT extended (B, 1, 1, Skv) additive mask.
    # TODO(synk): per-query (B, 1, S, Skv) masks would need a (tq, Skv) mask tile.
    mask = mask.reshape(B, 1, Skv).astype(jnp.float32)

    # Query tile: 256 suits the v6e/v7x 256x256 MXU; pass q_block=128 on v5e.
    tq = q_block if q_block is not None else min(S, 256)
    if S % tq != 0:
        tq = S  # TODO(synk): pad / ragged handling when S is not divisible by tq.

    # Weights are already stored in compute_dtype (bf16) by make_attention_params
    # — no per-call convert kernels / extra HBM pass here.
    args = (hidden_states, kv, mask,
            params["wq"], params["wk"], params["wv"], params["bias"])

    builder = functools.partial(
        _build_attention_call, B, S, Hq, Skv, E, H, tq, num_heads, head_dim,
        compute_dtype, exp_dtype, out_dtype, vmem_limit_bytes)
    try:
        return builder(weight_buffer_count=1)(*args)
    except Exception:
        # TODO(synk): this jax build rejects pl.Buffered(1); fall back to the
        # default double-buffered weight pipeline (costs ~2x weight VMEM).
        return builder(weight_buffer_count=None)(*args)


def make_attention_params(key, hidden, kv_width, all_head_size=None,
                          compute_dtype=jnp.bfloat16):
    """Deterministic nn.Linear-equivalent parameters for one BertSelfAttention.

    Weights are pre-transposed to (in_features, out_features) and pre-cast to
    bf16 ONCE here; the three biases are packed into a sublane-aligned (8, H)
    tile with rows [bq, bk, bv, pad x 5].
    """
    all_head_size = hidden if all_head_size is None else all_head_size
    ks = jax.random.split(key, 6)
    scale = 0.02
    bias = jnp.zeros((8, all_head_size), jnp.float32)
    bias = bias.at[0].set(scale * jax.random.normal(ks[1], (all_head_size,), jnp.float32))
    bias = bias.at[1].set(scale * jax.random.normal(ks[3], (all_head_size,), jnp.float32))
    bias = bias.at[2].set(scale * jax.random.normal(ks[5], (all_head_size,), jnp.float32))
    mk = lambda k, d_in: (scale * jax.random.normal(
        k, (d_in, all_head_size), jnp.float32)).astype(compute_dtype)
    return {
        "wq": mk(ks[0], hidden),
        "wk": mk(ks[2], kv_width),
        "wv": mk(ks[4], kv_width),
        "bias": bias,
    }


# --- pure-JAX reference (mirrors the kernel's bf16 matmul casts, exact softmax)
def _ref_attention(x, kv, mask, params, num_heads, compute_dtype=jnp.bfloat16):
    B, S, _ = x.shape
    _, Skv, _ = kv.shape
    H = params["wq"].shape[1]
    hd = H // num_heads
    cd = compute_dtype
    f32 = jnp.float32
    bias = params["bias"]
    q = jnp.einsum("bse,eh->bsh", x.astype(cd), params["wq"],
                   preferred_element_type=f32) + bias[0]
    k = jnp.einsum("bse,eh->bsh", kv.astype(cd), params["wk"],
                   preferred_element_type=f32) + bias[1]
    v = jnp.einsum("bse,eh->bsh", kv.astype(cd), params["wv"],
                   preferred_element_type=f32) + bias[2]
    q = q / math.sqrt(hd)
    q = q.reshape(B, S, num_heads, hd).transpose(0, 2, 1, 3).astype(cd)
    k = k.reshape(B, Skv, num_heads, hd).transpose(0, 2, 1, 3).astype(cd)
    v = v.reshape(B, Skv, num_heads, hd).transpose(0, 2, 1, 3).astype(cd)
    s = jnp.einsum("bhqd,bhkd->bhqk", q, k, preferred_element_type=f32)
    s = s + mask.reshape(B, 1, 1, Skv)
    p = jax.nn.softmax(s, axis=-1)
    ctx = jnp.einsum("bhqk,bhkd->bhqd", p.astype(cd), v,
                     preferred_element_type=f32)
    return ctx.transpose(0, 2, 1, 3).reshape(B, S, H)


if __name__ == "__main__":
    B, S, S_ENC = 2, 8, 16
    HIDDEN, NUM_HEADS, ENC_WIDTH = 32, 4, 48

    key = jax.random.PRNGKey(0)
    k_hs, k_enc, k_pself, k_pcross = jax.random.split(key, 4)

    hidden_states = jax.random.normal(k_hs, (B, S, HIDDEN), jnp.float32)
    encoder_hidden_states = jax.random.normal(k_enc, (B, S_ENC, ENC_WIDTH), jnp.float32)

    # Additive masks (extended-mask convention): 0 = keep, -1e9 = masked.
    attention_mask = jnp.zeros((B, 1, S), jnp.float32)
    attention_mask = attention_mask.at[1, 0, S - 1].set(-1e9)
    encoder_attention_mask = jnp.zeros((B, 1, S_ENC), jnp.float32)
    encoder_attention_mask = encoder_attention_mask.at[0, 0, S_ENC - 2:].set(-1e9)

    params_self = make_attention_params(k_pself, HIDDEN, HIDDEN)       # self-attn
    params_cross = make_attention_params(k_pcross, HIDDEN, ENC_WIDTH)  # cross-attn

    # Self-attention mode of BertSelfAttention.
    out_self = bert_self_attention(hidden_states, attention_mask,
                                   params=params_self, num_heads=NUM_HEADS)
    # Cross-attention mode of BertSelfAttention.
    out_cross = bert_self_attention(hidden_states, attention_mask,
                                    encoder_hidden_states, encoder_attention_mask,
                                    params=params_cross, num_heads=NUM_HEADS)
    out_self, out_cross = jax.block_until_ready((out_self, out_cross))

    # Sanity check vs. pure-JAX reference (same bf16 matmul casts; tolerance
    # covers the EUP approximate-reciprocal softmax normalization).
    ref_self = _ref_attention(hidden_states, hidden_states, attention_mask,
                              params_self, NUM_HEADS)
    ref_cross = _ref_attention(hidden_states, encoder_hidden_states,
                               encoder_attention_mask, params_cross, NUM_HEADS)
    assert out_self.shape == (B, S, HIDDEN) and out_cross.shape == (B, S, HIDDEN)
    assert bool(jnp.allclose(out_self, ref_self, atol=2e-2, rtol=2e-2)), \
        "self-attention mismatch vs reference"
    assert bool(jnp.allclose(out_cross, ref_cross, atol=2e-2, rtol=2e-2)), \
        "cross-attention mismatch vs reference"

    print("KERNEL_OK")
</pallas_src>

<mosaic_0001>
module attributes {stable_mosaic.version = 11 : i64} {
  func.func @_attention_kernel(%arg0: i32, %arg1: i32, %arg2: memref<1x8x32xf32, #tpu.memory_space<vmem>>, %arg3: memref<1x8x32xf32, #tpu.memory_space<vmem>>, %arg4: memref<1x1x8xf32, #tpu.memory_space<vmem>>, %arg5: memref<32x32xbf16, #tpu.memory_space<vmem>>, %arg6: memref<32x32xbf16, #tpu.memory_space<vmem>>, %arg7: memref<32x32xbf16, #tpu.memory_space<vmem>>, %arg8: memref<8x32xf32, #tpu.memory_space<vmem>>, %arg9: memref<1x8x32xf32, #tpu.memory_space<vmem>>, %arg10: memref<4x8x8xbf16, #tpu.memory_space<vmem>>, %arg11: memref<4x8x8xbf16, #tpu.memory_space<vmem>>) attributes {dimension_semantics = [#tpu.dimension_semantics<parallel>, #tpu.dimension_semantics<arbitrary>], iteration_bounds = array<i64: 2, 1>, scalar_prefetch = 0 : i64, scratch_operands = 2 : i64, tpu.core_type = #tpu.core_type<tc>, window_params = [{transform_indices = @transform_0, window_bounds = array<i64: 1, 8, 32>}, {transform_indices = @transform_1, window_bounds = array<i64: 1, 8, 32>}, {transform_indices = @transform_2, window_bounds = array<i64: 1, 1, 8>}, {pipeline_mode = #tpu.pipeline_mode<synchronous>, transform_indices = @transform_3, window_bounds = array<i64: 32, 32>}, {pipeline_mode = #tpu.pipeline_mode<synchronous>, transform_indices = @transform_4, window_bounds = array<i64: 32, 32>}, {pipeline_mode = #tpu.pipeline_mode<synchronous>, transform_indices = @transform_5, window_bounds = array<i64: 32, 32>}, {pipeline_mode = #tpu.pipeline_mode<synchronous>, transform_indices = @transform_6, window_bounds = array<i64: 8, 32>}, {transform_indices = @transform_7, window_bounds = array<i64: 1, 8, 32>}]} {
    %c0 = arith.constant 0 : index
    %c0_0 = arith.constant 0 : index
    %0 = vector.load %arg8[%c0, %c0_0] : memref<8x32xf32, #tpu.memory_space<vmem>>, vector<8x32xf32>
    %c0_i32 = arith.constant 0 : i32
    %1 = arith.cmpi eq, %arg1, %c0_i32 : i32
    %2 = arith.extui %1 : i1 to i32
    %c0_i32_1 = arith.constant 0 : i32
    %3 = arith.cmpi ne, %2, %c0_i32_1 : i32
    scf.if %3 {
      %c0_24 = arith.constant 0 : index
      %c0_25 = arith.constant 0 : index
      %c0_26 = arith.constant 0 : index
      %42 = vector.load %arg3[%c0_24, %c0_25, %c0_26] : memref<1x8x32xf32, #tpu.memory_space<vmem>>, vector<1x8x32xf32>
      %43 = vector.shape_cast %42 : vector<1x8x32xf32> to vector<8x32xf32>
      %44 = arith.truncf %43 : vector<8x32xf32> to vector<8x32xbf16>
      %c0_27 = arith.constant 0 : index
      %c0_28 = arith.constant 0 : index
      %45 = vector.load %arg6[%c0_27, %c0_28] : memref<32x32xbf16, #tpu.memory_space<vmem>>, vector<32x32xbf16>
      %cst_29 = arith.constant dense<0.000000e+00> : vector<8x32xf32>
      %46 = tpu.matmul %44, %45, %cst_29 {dimension_numbers = #tpu.dot_dimension_numbers<[1], [0], [0], [1], [0, 0, 1, 1], [], []>} : vector<8x32xbf16>, vector<32x32xbf16>, vector<8x32xf32> -> vector<8x32xf32>
      %47 = vector.extract_strided_slice %0 {offsets = [1, 0], sizes = [1, 32], strides = [1, 1]} : vector<8x32xf32> to vector<1x32xf32>
      %48 = vector.broadcast %47 : vector<1x32xf32> to vector<8x32xf32>
      %49 = arith.addf %46, %48 : vector<8x32xf32>
      %c0_30 = arith.constant 0 : index
      %c0_31 = arith.constant 0 : index
      %50 = vector.load %arg7[%c0_30, %c0_31] : memref<32x32xbf16, #tpu.memory_space<vmem>>, vector<32x32xbf16>
      %cst_32 = arith.constant dense<0.000000e+00> : vector<8x32xf32>
      %51 = tpu.matmul %44, %50, %cst_32 {dimension_numbers = #tpu.dot_dimension_numbers<[1], [0], [0], [1], [0, 0, 1, 1], [], []>} : vector<8x32xbf16>, vector<32x32xbf16>, vector<8x32xf32> -> vector<8x32xf32>
      %52 = vector.extract_strided_slice %0 {offsets = [2, 0], sizes = [1, 32], strides = [1, 1]} : vector<8x32xf32> to vector<1x32xf32>
      %53 = vector.broadcast %52 : vector<1x32xf32> to vector<8x32xf32>
      %54 = arith.addf %51, %53 : vector<8x32xf32>
      %55 = vector.shape_cast %49 : vector<8x32xf32> to vector<8x4x8xf32>
      %56 = tpu.transpose %55, [1, 0, 2] : vector<8x4x8xf32> -> vector<4x8x8xf32>
      %57 = vector.shape_cast %54 : vector<8x32xf32> to vector<8x4x8xf32>
      %58 = tpu.transpose %57, [1, 0, 2] : vector<8x4x8xf32> -> vector<4x8x8xf32>
      %59 = arith.truncf %56 : vector<4x8x8xf32> to vector<4x8x8xbf16>
      %c0_33 = arith.constant 0 : index
      %c0_34 = arith.constant 0 : index
      %c0_35 = arith.constant 0 : index
      %60 = vector.load %arg10[%c0_33, %c0_34, %c0_35] : memref<4x8x8xbf16, #tpu.memory_space<vmem>>, vector<4x8x8xbf16>
      tpu.vector_store %arg10[%c0_33, %c0_34, %c0_35], %59 {strides = array<i32>} : memref<4x8x8xbf16, #tpu.memory_space<vmem>>, vector<4x8x8xbf16>,
      %61 = arith.truncf %58 : vector<4x8x8xf32> to vector<4x8x8xbf16>
      %c0_36 = arith.constant 0 : index
      %c0_37 = arith.constant 0 : index
      %c0_38 = arith.constant 0 : index
      %62 = vector.load %arg11[%c0_36, %c0_37, %c0_38] : memref<4x8x8xbf16, #tpu.memory_space<vmem>>, vector<4x8x8xbf16>
      tpu.vector_store %arg11[%c0_36, %c0_37, %c0_38], %61 {strides = array<i32>} : memref<4x8x8xbf16, #tpu.memory_space<vmem>>, vector<4x8x8xbf16>,
    } else {
    }
    %c0_2 = arith.constant 0 : index
    %c0_3 = arith.constant 0 : index
    %c0_4 = arith.constant 0 : index
    %4 = vector.load %arg2[%c0_2, %c0_3, %c0_4] : memref<1x8x32xf32, #tpu.memory_space<vmem>>, vector<1x8x32xf32>
    %5 = vector.shape_cast %4 : vector<1x8x32xf32> to vector<8x32xf32>
    %6 = arith.truncf %5 : vector<8x32xf32> to vector<8x32xbf16>
    %c0_5 = arith.constant 0 : index
    %c0_6 = arith.constant 0 : index
    %7 = vector.load %arg5[%c0_5, %c0_6] : memref<32x32xbf16, #tpu.memory_space<vmem>>, vector<32x32xbf16>
    %cst = arith.constant dense<0.000000e+00> : vector<8x32xf32>
    %8 = tpu.matmul %6, %7, %cst {dimension_numbers = #tpu.dot_dimension_numbers<[1], [0], [0], [1], [0, 0, 1, 1], [], []>} : vector<8x32xbf16>, vector<32x32xbf16>, vector<8x32xf32> -> vector<8x32xf32>
    %9 = vector.extract_strided_slice %0 {offsets = [0, 0], sizes = [1, 32], strides = [1, 1]} : vector<8x32xf32> to vector<1x32xf32>
    %10 = vector.broadcast %9 : vector<1x32xf32> to vector<8x32xf32>
    %11 = arith.addf %8, %10 : vector<8x32xf32>
    %cst_7 = arith.constant 0.353553385 : f32
    %12 = vector.broadcast %cst_7 : f32 to vector<8x32xf32>
    %13 = arith.mulf %11, %12 : vector<8x32xf32>
    %14 = vector.shape_cast %13 : vector<8x32xf32> to vector<8x4x8xf32>
    %15 = tpu.transpose %14, [1, 0, 2] : vector<8x4x8xf32> -> vector<4x8x8xf32>
    %16 = arith.truncf %15 : vector<4x8x8xf32> to vector<4x8x8xbf16>
    %c0_8 = arith.constant 0 : index
    %c0_9 = arith.constant 0 : index
    %c0_10 = arith.constant 0 : index
    %17 = vector.load %arg10[%c0_8, %c0_9, %c0_10] : memref<4x8x8xbf16, #tpu.memory_space<vmem>>, vector<4x8x8xbf16>
    "tpu.trace_start"() <{level = 10 : i32, message = "hqd,hkd->hqk"}> : () -> ()
    %cst_11 = arith.constant dense<0.000000e+00> : vector<4x8x8xf32>
    %18 = tpu.matmul %16, %17, %cst_11 {dimension_numbers = #tpu.dot_dimension_numbers<[2], [2], [1], [1], [0, 0, 0, 1, 1, 1], [0], [0]>} : vector<4x8x8xbf16>, vector<4x8x8xbf16>, vector<4x8x8xf32> -> vector<4x8x8xf32>
    "tpu.trace_stop"() : () -> ()
    %c0_12 = arith.constant 0 : index
    %c0_13 = arith.constant 0 : index
    %c0_14 = arith.constant 0 : index
    %19 = vector.load %arg4[%c0_12, %c0_13, %c0_14] : memref<1x1x8xf32, #tpu.memory_space<vmem>>, vector<1x1x8xf32>
    %20 = vector.shape_cast %19 : vector<1x1x8xf32> to vector<1x8xf32>
    %21 = vector.shape_cast %20 : vector<1x8xf32> to vector<1x1x8xf32>
    %22 = vector.broadcast %21 : vector<1x1x8xf32> to vector<4x8x8xf32>
    %23 = arith.addf %18, %22 : vector<4x8x8xf32>
    %cst_15 = arith.constant dense<0xFF800000> : vector<4x8xf32>
    %24 = vector.multi_reduction <maximumf>, %23, %cst_15 [2] : vector<4x8x8xf32> to vector<4x8xf32>
    %25 = vector.shape_cast %24 : vector<4x8xf32> to vector<4x8x1xf32>
    %26 = vector.broadcast %25 : vector<4x8x1xf32> to vector<4x8x8xf32>
    %27 = arith.subf %23, %26 : vector<4x8x8xf32>
    %28 = math.exp %27 : vector<4x8x8xf32>
    %cst_16 = arith.constant dense<0.000000e+00> : vector<4x8xf32>
    %29 = vector.multi_reduction <add>, %28, %cst_16 [2] : vector<4x8x8xf32> to vector<4x8xf32>
    %30 = vector.shape_cast %29 : vector<4x8xf32> to vector<4x8x1xf32>
    %31 = arith.truncf %28 : vector<4x8x8xf32> to vector<4x8x8xbf16>
    %c0_17 = arith.constant 0 : index
    %c0_18 = arith.constant 0 : index
    %c0_19 = arith.constant 0 : index
    %32 = vector.load %arg11[%c0_17, %c0_18, %c0_19] : memref<4x8x8xbf16, #tpu.memory_space<vmem>>, vector<4x8x8xbf16>
    "tpu.trace_start"() <{level = 10 : i32, message = "hqk,hkd->hqd"}> : () -> ()
    %cst_20 = arith.constant dense<0.000000e+00> : vector<4x8x8xf32>
    %33 = tpu.matmul %31, %32, %cst_20 {dimension_numbers = #tpu.dot_dimension_numbers<[2], [1], [1], [2], [0, 0, 0, 1, 1, 2], [0], [0]>} : vector<4x8x8xbf16>, vector<4x8x8xbf16>, vector<4x8x8xf32> -> vector<4x8x8xf32>
    "tpu.trace_stop"() : () -> ()
    %34 = tpu.reciprocal %30 {approx = true} : vector<4x8x1xf32> -> vector<4x8x1xf32>
    %35 = vector.broadcast %34 : vector<4x8x1xf32> to vector<4x8x8xf32>
    %36 = arith.mulf %33, %35 : vector<4x8x8xf32>
    %37 = tpu.transpose %36, [1, 0, 2] : vector<4x8x8xf32> -> vector<8x4x8xf32>
    %38 = vector.shape_cast %37 : vector<8x4x8xf32> to vector<8x32xf32>
    %c0_21 = arith.constant 0 : index
    %c0_22 = arith.constant 0 : index
    %c0_23 = arith.constant 0 : index
    %39 = vector.load %arg9[%c0_21, %c0_22, %c0_23] : memref<1x8x32xf32, #tpu.memory_space<vmem>>, vector<1x8x32xf32>
    %40 = vector.shape_cast %39 : vector<1x8x32xf32> to vector<8x32xf32>
    %41 = vector.shape_cast %38 : vector<8x32xf32> to vector<1x8x32xf32>
    tpu.vector_store %arg9[%c0_21, %c0_22, %c0_23], %41 {strides = array<i32>} : memref<1x8x32xf32, #tpu.memory_space<vmem>>, vector<1x8x32xf32>,
    return
  }
  func.func @transform_0(%arg0: i32, %arg1: i32) -> (i32, i32, i32) {
    %c0_i32 = arith.constant 0 : i32
    %c0_i32_0 = arith.constant 0 : i32
    return %arg0, %arg1, %c0_i32 : i32, i32, i32
  }
  func.func @transform_1(%arg0: i32, %arg1: i32) -> (i32, i32, i32) {
    %c0_i32 = arith.constant 0 : i32
    %c0_i32_0 = arith.constant 0 : i32
    %c0_i32_1 = arith.constant 0 : i32
    return %arg0, %c0_i32, %c0_i32_0 : i32, i32, i32
  }
  func.func @transform_2(%arg0: i32, %arg1: i32) -> (i32, i32, i32) {
    %c0_i32 = arith.constant 0 : i32
    %c0_i32_0 = arith.constant 0 : i32
    %c0_i32_1 = arith.constant 0 : i32
    return %arg0, %c0_i32, %c0_i32_0 : i32, i32, i32
  }
  func.func @transform_3(%arg0: i32, %arg1: i32) -> (i32, i32) {
    %c0_i32 = arith.constant 0 : i32
    %c0_i32_0 = arith.constant 0 : i32
    %c0_i32_1 = arith.constant 0 : i32
    return %c0_i32, %c0_i32_0 : i32, i32
  }
  func.func @transform_4(%arg0: i32, %arg1: i32) -> (i32, i32) {
    %c0_i32 = arith.constant 0 : i32
    %c0_i32_0 = arith.constant 0 : i32
    %c0_i32_1 = arith.constant 0 : i32
    return %c0_i32, %c0_i32_0 : i32, i32
  }
  func.func @transform_5(%arg0: i32, %arg1: i32) -> (i32, i32) {
    %c0_i32 = arith.constant 0 : i32
    %c0_i32_0 = arith.constant 0 : i32
    %c0_i32_1 = arith.constant 0 : i32
    return %c0_i32, %c0_i32_0 : i32, i32
  }
  func.func @transform_6(%arg0: i32, %arg1: i32) -> (i32, i32) {
    %c0_i32 = arith.constant 0 : i32
    %c0_i32_0 = arith.constant 0 : i32
    %c0_i32_1 = arith.constant 0 : i32
    return %c0_i32, %c0_i32_0 : i32, i32
  }
  func.func @transform_7(%arg0: i32, %arg1: i32) -> (i32, i32, i32) {
    %c0_i32 = arith.constant 0 : i32
    %c0_i32_0 = arith.constant 0 : i32
    return %arg0, %arg1, %c0_i32 : i32, i32, i32
  }
}

module attributes {stable_mosaic.version = 11 : i64} {
  func.func @_attention_kernel(%arg0: i32, %arg1: i32, %arg2: memref<1x8x32xf32, #tpu.memory_space<vmem>>, %arg3: memref<1x8x32xf32, #tpu.memory_space<vmem>>, %arg4: memref<1x1x8xf32, #tpu.memory_space<vmem>>, %arg5: memref<32x32xbf16, #tpu.memory_space<vmem>>, %arg6: memref<32x32xbf16, #tpu.memory_space<vmem>>, %arg7: memref<32x32xbf16, #tpu.memory_space<vmem>>, %arg8: memref<8x32xf32, #tpu.memory_space<vmem>>, %arg9: memref<1x8x32xf32, #tpu.memory_space<vmem>>, %arg10: memref<4x8x8xbf16, #tpu.memory_space<vmem>>, %arg11: memref<4x8x8xbf16, #tpu.memory_space<vmem>>) attributes {dimension_semantics = [#tpu.dimension_semantics<parallel>, #tpu.dimension_semantics<arbitrary>], iteration_bounds = array<i64: 2, 1>, scalar_prefetch = 0 : i64, scratch_operands = 2 : i64, tpu.core_type = #tpu.core_type<tc>, window_params = [{transform_indices = @transform_0, window_bounds = array<i64: 1, 8, 32>}, {transform_indices = @transform_1, window_bounds = array<i64: 1, 8, 32>}, {transform_indices = @transform_2, window_bounds = array<i64: 1, 1, 8>}, {pipeline_mode = #tpu.pipeline_mode<synchronous>, transform_indices = @transform_3, window_bounds = array<i64: 32, 32>}, {pipeline_mode = #tpu.pipeline_mode<synchronous>, transform_indices = @transform_4, window_bounds = array<i64: 32, 32>}, {pipeline_mode = #tpu.pipeline_mode<synchronous>, transform_indices = @transform_5, window_bounds = array<i64: 32, 32>}, {pipeline_mode = #tpu.pipeline_mode<synchronous>, transform_indices = @transform_6, window_bounds = array<i64: 8, 32>}, {transform_indices = @transform_7, window_bounds = array<i64: 1, 8, 32>}]} {
    %c0 = arith.constant 0 : index
    %c0_0 = arith.constant 0 : index
    %0 = vector.load %arg8[%c0, %c0_0] : memref<8x32xf32, #tpu.memory_space<vmem>>, vector<8x32xf32>
    %c0_i32 = arith.constant 0 : i32
    %1 = arith.cmpi eq, %arg1, %c0_i32 : i32
    %2 = arith.extui %1 : i1 to i32
    %c0_i32_1 = arith.constant 0 : i32
    %3 = arith.cmpi ne, %2, %c0_i32_1 : i32
    scf.if %3 {
      %c0_24 = arith.constant 0 : index
      %c0_25 = arith.constant 0 : index
      %c0_26 = arith.constant 0 : index
      %42 = vector.load %arg3[%c0_24, %c0_25, %c0_26] : memref<1x8x32xf32, #tpu.memory_space<vmem>>, vector<1x8x32xf32>
      %43 = vector.shape_cast %42 : vector<1x8x32xf32> to vector<8x32xf32>
      %44 = arith.truncf %43 : vector<8x32xf32> to vector<8x32xbf16>
      %c0_27 = arith.constant 0 : index
      %c0_28 = arith.constant 0 : index
      %45 = vector.load %arg6[%c0_27, %c0_28] : memref<32x32xbf16, #tpu.memory_space<vmem>>, vector<32x32xbf16>
      %cst_29 = arith.constant dense<0.000000e+00> : vector<8x32xf32>
      %46 = tpu.matmul %44, %45, %cst_29 {dimension_numbers = #tpu.dot_dimension_numbers<[1], [0], [0], [1], [0, 0, 1, 1], [], []>} : vector<8x32xbf16>, vector<32x32xbf16>, vector<8x32xf32> -> vector<8x32xf32>
      %47 = vector.extract_strided_slice %0 {offsets = [1, 0], sizes = [1, 32], strides = [1, 1]} : vector<8x32xf32> to vector<1x32xf32>
      %48 = vector.broadcast %47 : vector<1x32xf32> to vector<8x32xf32>
      %49 = arith.addf %46, %48 : vector<8x32xf32>
      %c0_30 = arith.constant 0 : index
      %c0_31 = arith.constant 0 : index
      %50 = vector.load %arg7[%c0_30, %c0_31] : memref<32x32xbf16, #tpu.memory_space<vmem>>, vector<32x32xbf16>
      %cst_32 = arith.constant dense<0.000000e+00> : vector<8x32xf32>
      %51 = tpu.matmul %44, %50, %cst_32 {dimension_numbers = #tpu.dot_dimension_numbers<[1], [0], [0], [1], [0, 0, 1, 1], [], []>} : vector<8x32xbf16>, vector<32x32xbf16>, vector<8x32xf32> -> vector<8x32xf32>
      %52 = vector.extract_strided_slice %0 {offsets = [2, 0], sizes = [1, 32], strides = [1, 1]} : vector<8x32xf32> to vector<1x32xf32>
      %53 = vector.broadcast %52 : vector<1x32xf32> to vector<8x32xf32>
      %54 = arith.addf %51, %53 : vector<8x32xf32>
      %55 = vector.shape_cast %49 : vector<8x32xf32> to vector<8x4x8xf32>
      %56 = tpu.transpose %55, [1, 0, 2] : vector<8x4x8xf32> -> vector<4x8x8xf32>
      %57 = vector.shape_cast %54 : vector<8x32xf32> to vector<8x4x8xf32>
      %58 = tpu.transpose %57, [1, 0, 2] : vector<8x4x8xf32> -> vector<4x8x8xf32>
      %59 = arith.truncf %56 : vector<4x8x8xf32> to vector<4x8x8xbf16>
      %c0_33 = arith.constant 0 : index
      %c0_34 = arith.constant 0 : index
      %c0_35 = arith.constant 0 : index
      %60 = vector.load %arg10[%c0_33, %c0_34, %c0_35] : memref<4x8x8xbf16, #tpu.memory_space<vmem>>, vector<4x8x8xbf16>
      tpu.vector_store %arg10[%c0_33, %c0_34, %c0_35], %59 {strides = array<i32>} : memref<4x8x8xbf16, #tpu.memory_space<vmem>>, vector<4x8x8xbf16>,
      %61 = arith.truncf %58 : vector<4x8x8xf32> to vector<4x8x8xbf16>
      %c0_36 = arith.constant 0 : index
      %c0_37 = arith.constant 0 : index
      %c0_38 = arith.constant 0 : index
      %62 = vector.load %arg11[%c0_36, %c0_37, %c0_38] : memref<4x8x8xbf16, #tpu.memory_space<vmem>>, vector<4x8x8xbf16>
      tpu.vector_store %arg11[%c0_36, %c0_37, %c0_38], %61 {strides = array<i32>} : memref<4x8x8xbf16, #tpu.memory_space<vmem>>, vector<4x8x8xbf16>,
    } else {
    }
    %c0_2 = arith.constant 0 : index
    %c0_3 = arith.constant 0 : index
    %c0_4 = arith.constant 0 : index
    %4 = vector.load %arg2[%c0_2, %c0_3, %c0_4] : memref<1x8x32xf32, #tpu.memory_space<vmem>>, vector<1x8x32xf32>
    %5 = vector.shape_cast %4 : vector<1x8x32xf32> to vector<8x32xf32>
    %6 = arith.truncf %5 : vector<8x32xf32> to vector<8x32xbf16>
    %c0_5 = arith.constant 0 : index
    %c0_6 = arith.constant 0 : index
    %7 = vector.load %arg5[%c0_5, %c0_6] : memref<32x32xbf16, #tpu.memory_space<vmem>>, vector<32x32xbf16>
    %cst = arith.constant dense<0.000000e+00> : vector<8x32xf32>
    %8 = tpu.matmul %6, %7, %cst {dimension_numbers = #tpu.dot_dimension_numbers<[1], [0], [0], [1], [0, 0, 1, 1], [], []>} : vector<8x32xbf16>, vector<32x32xbf16>, vector<8x32xf32> -> vector<8x32xf32>
    %9 = vector.extract_strided_slice %0 {offsets = [0, 0], sizes = [1, 32], strides = [1, 1]} : vector<8x32xf32> to vector<1x32xf32>
    %10 = vector.broadcast %9 : vector<1x32xf32> to vector<8x32xf32>
    %11 = arith.addf %8, %10 : vector<8x32xf32>
    %cst_7 = arith.constant 0.353553385 : f32
    %12 = vector.broadcast %cst_7 : f32 to vector<8x32xf32>
    %13 = arith.mulf %11, %12 : vector<8x32xf32>
    %14 = vector.shape_cast %13 : vector<8x32xf32> to vector<8x4x8xf32>
    %15 = tpu.transpose %14, [1, 0, 2] : vector<8x4x8xf32> -> vector<4x8x8xf32>
    %16 = arith.truncf %15 : vector<4x8x8xf32> to vector<4x8x8xbf16>
    %c0_8 = arith.constant 0 : index
    %c0_9 = arith.constant 0 : index
    %c0_10 = arith.constant 0 : index
    %17 = vector.load %arg10[%c0_8, %c0_9, %c0_10] : memref<4x8x8xbf16, #tpu.memory_space<vmem>>, vector<4x8x8xbf16>
    "tpu.trace_start"() <{level = 10 : i32, message = "hqd,hkd->hqk"}> : () -> ()
    %cst_11 = arith.constant dense<0.000000e+00> : vector<4x8x8xf32>
    %18 = tpu.matmul %16, %17, %cst_11 {dimension_numbers = #tpu.dot_dimension_numbers<[2], [2], [1], [1], [0, 0, 0, 1, 1, 1], [0], [0]>} : vector<4x8x8xbf16>, vector<4x8x8xbf16>, vector<4x8x8xf32> -> vector<4x8x8xf32>
    "tpu.trace_stop"() : () -> ()
    %c0_12 = arith.constant 0 : index
    %c0_13 = arith.constant 0 : index
    %c0_14 = arith.constant 0 : index
    %19 = vector.load %arg4[%c0_12, %c0_13, %c0_14] : memref<1x1x8xf32, #tpu.memory_space<vmem>>, vector<1x1x8xf32>
    %20 = vector.shape_cast %19 : vector<1x1x8xf32> to vector<1x8xf32>
    %21 = vector.shape_cast %20 : vector<1x8xf32> to vector<1x1x8xf32>
    %22 = vector.broadcast %21 : vector<1x1x8xf32> to vector<4x8x8xf32>
    %23 = arith.addf %18, %22 : vector<4x8x8xf32>
    %cst_15 = arith.constant dense<0xFF800000> : vector<4x8xf32>
    %24 = vector.multi_reduction <maximumf>, %23, %cst_15 [2] : vector<4x8x8xf32> to vector<4x8xf32>
    %25 = vector.shape_cast %24 : vector<4x8xf32> to vector<4x8x1xf32>
    %26 = vector.broadcast %25 : vector<4x8x1xf32> to vector<4x8x8xf32>
    %27 = arith.subf %23, %26 : vector<4x8x8xf32>
    %28 = math.exp %27 : vector<4x8x8xf32>
    %cst_16 = arith.constant dense<0.000000e+00> : vector<4x8xf32>
    %29 = vector.multi_reduction <add>, %28, %cst_16 [2] : vector<4x8x8xf32> to vector<4x8xf32>
    %30 = vector.shape_cast %29 : vector<4x8xf32> to vector<4x8x1xf32>
    %31 = arith.truncf %28 : vector<4x8x8xf32> to vector<4x8x8xbf16>
    %c0_17 = arith.constant 0 : index
    %c0_18 = arith.constant 0 : index
    %c0_19 = arith.constant 0 : index
    %32 = vector.load %arg11[%c0_17, %c0_18, %c0_19] : memref<4x8x8xbf16, #tpu.memory_space<vmem>>, vector<4x8x8xbf16>
    "tpu.trace_start"() <{level = 10 : i32, message = "hqk,hkd->hqd"}> : () -> ()
    %cst_20 = arith.constant dense<0.000000e+00> : vector<4x8x8xf32>
    %33 = tpu.matmul %31, %32, %cst_20 {dimension_numbers = #tpu.dot_dimension_numbers<[2], [1], [1], [2], [0, 0, 0, 1, 1, 2], [0], [0]>} : vector<4x8x8xbf16>, vector<4x8x8xbf16>, vector<4x8x8xf32> -> vector<4x8x8xf32>
    "tpu.trace_stop"() : () -> ()
    %34 = tpu.reciprocal %30 {approx = true} : vector<4x8x1xf32> -> vector<4x8x1xf32>
    %35 = vector.broadcast %34 : vector<4x8x1xf32> to vector<4x8x8xf32>
    %36 = arith.mulf %33, %35 : vector<4x8x8xf32>
    %37 = tpu.transpose %36, [1, 0, 2] : vector<4x8x8xf32> -> vector<8x4x8xf32>
    %38 = vector.shape_cast %37 : vector<8x4x8xf32> to vector<8x32xf32>
    %c0_21 = arith.constant 0 : index
    %c0_22 = arith.constant 0 : index
    %c0_23 = arith.constant 0 : index
    %39 = vector.load %arg9[%c0_21, %c0_22, %c0_23] : memref<1x8x32xf32, #tpu.memory_space<vmem>>, vector<1x8x32xf32>
    %40 = vector.shape_cast %39 : vector<1x8x32xf32> to vector<8x32xf32>
    %41 = vector.shape_cast %38 : vector<8x32xf32> to vector<1x8x32xf32>
    tpu.vector_store %arg9[%c0_21, %c0_22, %c0_23], %41 {strides = array<i32>} : memref<1x8x32xf32, #tpu.memory_space<vmem>>, vector<1x8x32xf32>,
    return
  }
  func.func @transform_0(%arg0: i32, %arg1: i32) -> (i32, i32, i32) {
    %c0_i32 = arith.constant 0 : i32
    %c0_i32_0 = arith.constant 0 : i32
    return %arg0, %arg1, %c0_i32 : i32, i32, i32
  }
  func.func @transform_1(%arg0: i32, %arg1: i32) -> (i32, i32, i32) {
    %c0_i32 = arith.constant 0 : i32
    %c0_i32_0 = arith.constant 0 : i32
    %c0_i32_1 = arith.constant 0 : i32
    return %arg0, %c0_i32, %c0_i32_0 : i32, i32, i32
  }
  func.func @transform_2(%arg0: i32, %arg1: i32) -> (i32, i32, i32) {
    %c0_i32 = arith.constant 0 : i32
    %c0_i32_0 = arith.constant 0 : i32
    %c0_i32_1 = arith.constant 0 : i32
    return %arg0, %c0_i32, %c0_i32_0 : i32, i32, i32
  }
  func.func @transform_3(%arg0: i32, %arg1: i32) -> (i32, i32) {
    %c0_i32 = arith.constant 0 : i32
    %c0_i32_0 = arith.constant 0 : i32
    %c0_i32_1 = arith.constant 0 : i32
    return %c0_i32, %c0_i32_0 : i32, i32
  }
  func.func @transform_4(%arg0: i32, %arg1: i32) -> (i32, i32) {
    %c0_i32 = arith.constant 0 : i32
    %c0_i32_0 = arith.constant 0 : i32
    %c0_i32_1 = arith.constant 0 : i32
    return %c0_i32, %c0_i32_0 : i32, i32
  }
  func.func @transform_5(%arg0: i32, %arg1: i32) -> (i32, i32) {
    %c0_i32 = arith.constant 0 : i32
    %c0_i32_0 = arith.constant 0 : i32
    %c0_i32_1 = arith.constant 0 : i32
    return %c0_i32, %c0_i32_0 : i32, i32
  }
  func.func @transform_6(%arg0: i32, %arg1: i32) -> (i32, i32) {
    %c0_i32 = arith.constant 0 : i32
    %c0_i32_0 = arith.constant 0 : i32
    %c0_i32_1 = arith.constant 0 : i32
    return %c0_i32, %c0_i32_0 : i32, i32
  }
  func.func @transform_7(%arg0: i32, %arg1: i32) -> (i32, i32, i32) {
    %c0_i32 = arith.constant 0 : i32
    %c0_i32_0 = arith.constant 0 : i32
    return %arg0, %arg1, %c0_i32 : i32, i32, i32
  }
}

</mosaic_0001>

<bundles_post_ra>
// kernel: tpu_custom_call.1
= control target key start
LH: loop header
LB: loop body
LE: loop exit
PB: predicated region body
PF: predicated region fallthrough
CT: control target
= control target key end

     0   :  { %s2445_s0 = inlined_call_operand.hbm [shape: f32[2,8,32], index: 0, kind: input, shape index: {}]   ;;  %s2446_s1 = inlined_call_operand.hbm [shape: f32[2,8,32], index: 1, kind: input, shape index: {}]   ;;  %s2447_s2 = inlined_call_operand.hbm [shape: f32[2,1,8], index: 2, kind: input, shape index: {}]   ;;  %s2448_s3 = inlined_call_operand.hbm [shape: bf16[32,32], index: 3, kind: input, shape index: {}]   ;;  %s2449_s4 = inlined_call_operand.hbm [shape: bf16[32,32], index: 4, kind: input, shape index: {}]   ;;  %s2450_s5 = inlined_call_operand.hbm [shape: bf16[32,32], index: 5, kind: input, shape index: {}]   ;;  %s2451_s6 = inlined_call_operand.hbm [shape: f32[8,32], index: 6, kind: input, shape index: {}]   ;;  %s2452_s7 = inlined_call_operand.hbm [shape: f32[2,8,32], index: 7, kind: output, shape index: {}]  }
   0x1   :  { %2461 = sst [smem:[#allocation28_spill]] %s2446_s1 }
   0x2   :  { %2462 = sst [smem:[#allocation29_spill]] %s2448_s3 }
   0x3   :  { %2463 = sst [smem:[#allocation30_spill]] %s2449_s4 }
   0x4   :  { %2464 = sst [smem:[#allocation31_spill]] %s2450_s5 }
   0x5   :  { %2465 = sst [smem:[#allocation32_spill]] %s2451_s6 }
   0x6   :  { %12 = vsyncpa [#allocation5], 0 }
   0x7   :  { %14 = vsyncpa [#allocation5 + $0x1], 0 }
   0x8   :  { %15 = vsyncpa [#allocation8], 0 }
   0x9   :  { %17 = vsyncpa [#allocation8 + $0x1], 0 }
   0xa   :  { %18 = vsyncpa [#allocation11], 0 }
   0xb   :  { %19 = vsyncpa [#allocation14], 0 }
   0xc   :  { %20 = vsyncpa [#allocation6], 0 }
   0xd   :  { %22 = vsyncpa [#allocation6 + $0x1], 0  ;;  %s2021_s24 = smov 0   ;;  %s2023_s25 = smov 0  }
   0xe   :  { %s2025_s26 = smov 0   ;;  %s2027_s27 = smov 0  }
   0xf   :  { %s2029_s28 = smov 0   ;;  %s2031_s29 = smov 0  }
  0x10 LB: > { %2466 = sst [smem:[#allocation22_spill]] %s1945_s24  ;;  %s2052_s30 = sadd.s32 4294967295, %s1965_s29   ;;  %s1965_s29 = sphi %s2031_s29, %s28_s29   ;;  %s1961_s28 = sphi %s2029_s28, %s2496_s28   ;;  %s1957_s27 = sphi %s2027_s27, %s2495_s27   ;;  %s1953_s26 = sphi %s2025_s26, %s2491_s26   ;;  %s1949_s25 = sphi %s2023_s25, %s2494_s25   ;;  %s1945_s24 = sphi %s2021_s24, %s2493_s24  }
  0x11   : > { %2467 = sst [smem:[#allocation23_spill]] %s1953_s26  ;;  %p1458_p0 = scmp.ge.s32.totalorder %s1965_s29, 1 }
  0x12   : > { %2468 = sst [smem:[#allocation24_spill]] %s1965_s29  ;;  %p63_p1 = scmp.eq.s32.totalorder %s2052_s30, 0 }
  0x13   : > { %p237_p2 = scmp.lt.s32.totalorder %s1965_s29, 3  ;;  %s2469_s3 = sld [smem:[#allocation29_spill]] }
  0x14   : > { %s1967_s12 = smov [#allocation10]   ;;  %s2472_s5 = sld [smem:[#allocation31_spill]] }
  0x15   : > { %p2060_p3 = pnand %p1458_p0, %p237_p2  ;;  %s250_s13 = sshll.u32 %s1967_s12, 4  ;;  %s251_s13 = int_to_ptr.vmem [resolvable:$true] %s250_s13 }
  0x16   : > { %s2453_s18 = smov 64   ;;  %s2454_s19 = smov 4  }
  0x17   : > { %p1545_p4 = pneg %p2060_p3  ;;  %s1970_s20 = smov [#allocation13]  }
  0x18   : > { %s278_s21 = sshll.u32 %s1970_s20, 4  ;;  %s1457_s22 = sadd.s32 4294967294, %s1965_s29   ;;  %s279_s21 = int_to_ptr.vmem [resolvable:$true] %s278_s21 }
  0x19   : > { %s248_s10 = sshll.u32 %s2469_s3, 4  ;;  %p2068_p5 = pnand %p1545_p4, %p63_p1  ;;  %s249_s10 = int_to_ptr.hbm [resolvable:$true] %s248_s10 }
  0x1a   : > { %s276_s17 = sshll.u32 %s2472_s5, 4  ;;  %s40_s23 = sadd.s32 1, %s1961_s28  ;;  %s277_s17 = int_to_ptr.hbm [resolvable:$true] %s276_s17 }
  0x1b   : > { %1548 = dma.hbm_to_vmem [thread:$0]  (!%p2068_p5), %s249_s10, 256, %s251_s13, [#allocation11], %s2453_s18, %s2453_s18, %s2454_s19  }
  0x1c   : > { %1554 = dma.hbm_to_vmem [thread:$0]  (!%p2068_p5), %s277_s17, 256, %s279_s21, [#allocation14], %s2453_s18, %s2453_s18, %s2454_s19  }
  0x1d   : > { %p42_p7 = scmp.ge.s32.totalorder %s40_s23, 2  ;;  %s49_s8 = sadd.s32 1, %s1953_s26 }
  0x1e   : > { %p56_p8 = scmp.ne.s32.totalorder %s1953_s26, %s1949_s25  ;;  %p57_p9 = scmp.eq.s32.totalorder %s1965_s29, 0 }
  0x1f   : > { %s2498_s23 = smov (%p42_p7, %s40_s23), 0  ;;  %p62_p11 = scmp.ne.s32.totalorder %s1949_s25, %s1945_s24 }
  0x20   : > { %2473 = sst [smem:[#allocation25_spill]] %s2498_s23  ;;  %p2094_p10 = por %p57_p9, %p56_p8 }
  0x21   : > { %s44_s10 = ssub.s32 %s1961_s28, %s2498_s23  ;;  %p224_p12 = scmp.eq.s32.totalorder %s2052_s30, 1 }
  0x22   : > { %p47_p13 = scmp.eq.s32.totalorder %s44_s10, 0  ;;  %p2105_p0 = por %p63_p1, %p62_p11 }
  0x23   : > { %p2109_p2 = por %p224_p12, %p56_p8  ;;  %p230_p4 = scmp.eq.s32.totalorder %s1457_s22, 1 }
  0x24   : > { %s2114_s15 = scalar_select %p47_p13, %s1953_s26, %s49_s8  }
  0x25   : > { %p2116_p7 = por %p230_p4, %p62_p11  ;;  %p1576_p9 = scmp.lt.s32.totalorder %s1965_s29, 2 }
  0x26   : > { %2477 = sst [smem:[#allocation26_spill]] %s2114_s15  ;;  %s2122_s17 = sand.u32 1, %s1953_s26  }
  0x27   : > { %s2478_s16 = scalar_select %p2116_p7, 1, 0 }
  0x28   : > { %s1465_s20 = sshll.u32 %s1961_s28, 3  ;;  %s1464_s21 = sshll.u32 %s2122_s17, 3 }
  0x29   : > { %2479 = sst [smem:[#allocation27_spill]] %s2478_s16  ;;  %p2128_p6 = pnand %p1576_p9, %p2094_p10 }
  0x2a   : > { %s324_s18 = sand.u32 1, %s1965_s29   ;;  %s2481_s1 = sld [smem:[#allocation28_spill]] }
  0x2b   : > { %s328_s3 = scalar_lea.vmem [#allocation7], %s1464_s21  ;;  %s2482_s4 = sld [smem:[#allocation30_spill]] }
  0x2c   : > { %s336_s5 = sshll.u32 %s328_s3, 4  ;;  %s325_s16 = scalar_lea.sflag [#allocation8], %s324_s18  ;;  %s337_s5 = int_to_ptr.vmem [resolvable:$true] %s336_s5 }
  0x2d   : > { %s1971_s29 = smov [#allocation12]   ;;  %s2483_s6 = sld [smem:[#allocation32_spill]] }
  0x2e   : > { %s264_s24 = sshll.u32 %s1971_s29, 4  ;;  %s1972_s26 = smov [#allocation15]   ;;  %s265_s24 = int_to_ptr.vmem [resolvable:$true] %s264_s24 }
  0x2f   : > { %s313_s29 = scalar_lea.hbm %s2445_s0, %s1465_s20  ;;  %s308_s22 = scalar_lea.vmem [#allocation4], %s1464_s21 }
  0x30   : > { %s332_s19 = scalar_lea.hbm %s2481_s1, %s1465_s20  ;;  %s2485_s1 = smov 64  }
  0x31   : > { %s334_s23 = sshll.u32 %s332_s19, 4  ;;  %s262_s9 = sshll.u32 %s2482_s4, 4  ;;  %s335_s23 = int_to_ptr.hbm [resolvable:$true] %s334_s23  ;;  %s263_s9 = int_to_ptr.hbm [resolvable:$true] %s262_s9 }
  0x32   : > { %1564 = dma.hbm_to_vmem [thread:$0]  (!%p2128_p6), %s335_s23, 128, %s337_s5, %s325_s16  }
  0x33   : > { %s291_s3 = sshll.u32 %s2483_s6, 4  ;;  %s2484_s19 = smov 4   ;;  %s292_s3 = int_to_ptr.hbm [resolvable:$true] %s291_s3 }
  0x34   : > { %1551 = dma.hbm_to_vmem [thread:$0]  (!%p2068_p5), %s263_s9, 256, %s265_s24, [#allocation11], %s2485_s1, %s2485_s1, %s2484_s19  }
  0x35   : > { %s293_s5 = sshll.u32 %s1972_s26, 4  ;;  %s315_s15 = sshll.u32 %s313_s29, 4  ;;  %s294_s5 = int_to_ptr.vmem [resolvable:$true] %s293_s5  ;;  %s316_s15 = int_to_ptr.hbm [resolvable:$true] %s315_s15 }
  0x36   : > { %1557 = dma.hbm_to_vmem [thread:$0]  (!%p2068_p5), %s292_s3, 128, %s294_s5, [#allocation14]  }
  0x37   : > { %s317_s8 = sshll.u32 %s308_s22, 4  ;;  %s305_s4 = scalar_lea.sflag [#allocation5], %s2122_s17  ;;  %s318_s8 = int_to_ptr.vmem [resolvable:$true] %s317_s8 }
  0x38   : > { %1561 = dma.hbm_to_vmem [thread:$0]  (!%p2128_p6), %s316_s15, 128, %s318_s8, %s305_s4  }
  0x39   : > { %s349_s24 = scalar_lea.hbm %s2447_s2, %s1961_s28  ;;  %s346_s19 = scalar_lea.vmem [#allocation9], %s2122_s17 }
  0x3a   : > { %s351_s9 = sshll.u32 %s349_s24, 4  ;;  %s353_s26 = sshll.u32 %s346_s19, 4  ;;  %s352_s9 = int_to_ptr.hbm [resolvable:$true] %s351_s9  ;;  %s354_s26 = int_to_ptr.vmem [resolvable:$true] %s353_s26 }
  0x3b   : > { %1567 = dma.hbm_to_vmem [thread:$0]  (!%p2128_p6), %s352_s9, 16, %s354_s26, %s325_s16  }
  0x3c   : > { %362 = sbr.rel (%p2060_p3) target bundleno = 922 (0x39a), region = 48  ;;  %s2167_s14 = sand.u32 (!%p2060_p3), 1, %s1949_s25  }
  0x3d   : > { %s2170_s4 = sshll.u32 (!%p2060_p3), %s2167_s14, 3  ;;  %s365_s6 = scalar_lea.sflag (!%p2060_p3), [#allocation5], %s2167_s14 }
  0x3e   : > { %s368_s20 = scalar_lea.vmem (!%p2060_p3), [#allocation4], %s2170_s4 }
  0x41   : > { %1924 = dma.done.wait (%p2105_p0), %s365_s6, 128  }
  0x42   : > { %1926 = vsyncadd (%p2105_p0), %s365_s6, 4294967168  ;;  %s374_s11 = sand.u32 1, %s2052_s30   ;;  %s378_s17 = scalar_lea.vmem [#allocation7], %s2170_s4 }
  0x43   : > { %s375_s16 = scalar_lea.sflag [#allocation8], %s374_s11 }
  0x44   : > { %1928 = dma.done.wait (%p2105_p0), %s375_s16, 144  }
  0x45   : > { %1930 = vsyncadd (%p2105_p0), %s375_s16, 4294967152  ;;  %s387_s21 = scalar_lea.vmem [#allocation9], %s2167_s14 }
  0x46   : > { %1932 = dma.done.wait (%p63_p1), [#allocation11], 512  }
  0x47   : > { %1934 = vsyncadd (%p63_p1), [#allocation11], 4294966784 }
  0x48   : > { %1936 = dma.done.wait (%p63_p1), [#allocation14], 384  }
  0x49   : > { %1938 = vsyncadd (%p63_p1), [#allocation14], 4294966912  ;;  %v1516_v0 = vld [vmem:[#allocation12 + $0x8] sm:$0xff]  ;;  %v1520_v1 = vld [vmem:[#allocation10 + $0x8] sm:$0xff]  ;;  %vm473_vm0 = vcmask 261120   ;;  %s1973_s30 = smov 104  }
  0x4a   : > { %v1515_v2 = vld [vmem:[#allocation12] sm:$0xff]  ;;  %v1519_v3 = vld [vmem:[#allocation10] sm:$0xff]  ;;  %483 = vmatpush.bf16.msra.mxu0 %v1516_v0  ;;  %807 = vmatpush.bf16.msra.mxu2 %v1520_v1  ;;  %v1518_v8 = vld [vmem:[#allocation13 + $0x8] sm:$0xff]  ;;  %s1974_s12 = smov 120   ;;  %s1975_s10 = smov 112   ;;  %vm531_vm1 = vcmask 1047556  }
  0x4b   : > { %v454_v4 = vld [vmem:[%s378_s17] sm:$0xff]  ;;  %v778_v5 = vld [vmem:[%s368_s20] sm:$0xff]  ;;  %513 = vmatpush.bf16.msra.mxu1 %v1518_v8  ;;  %v1976_v25 = vmov 1983009808   ;;  %v1977_v38 = vmov 1934713408  }
  0x4c   : > { %v455_v6 = vpack.c.bf16 %v454_v4, %v454_v4  ;;  %v779_v7 = vpack.c.bf16 %v778_v5, %v778_v5  ;;  %v1517_v9 = vld [vmem:[#allocation13] sm:$0xff]  ;;  %v449_v10 = vld [vmem:[#allocation15] sm:$0xff]  ;;  %v536_v26 = vunpack.c.l.s4 %v1976_v25  ;;  %v560_v39 = vunpack.c.l.s4 %v1977_v38  ;;  %s1978_s3 = smov 24   ;;  %s1979_s5 = smov 16  }
  0x4d   : > { %v460_v11 = vperm.slane %v449_v10, 1  ;;  %v784_v14 = vperm.slane %v449_v10, 0  ;;  %v494_v20 = vperm.slane %v449_v10, 2  ;;  %vm765_vm2 = vcmask 60416   ;;  %s1980_s18 = smov 8   ;;  %s1512_s23 = sshll.u32 %s1957_s27, 3 }
  0x4e   : > { %484 = vmatpush.bf16.msra.mxu0 %v1515_v2  ;;  %808 = vmatpush.bf16.msra.mxu2 %v1519_v3  ;;  %v2206_v33 = vunpack.c.0.s8 %v536_v26  ;;  %v2217_v48 = vunpack.c.0.s8 %v560_v39  ;;  %vm948_vm3 = vcmask 64512   ;;  %vm1072_vm4 = vcmask 1043456   ;;  %s1294_s22 = scalar_lea.hbm %s2452_s7, %s1512_s23  ;;  %s447_s8 = scalar_lea.vmem [#allocation16], %s2170_s4 }
  0x4f   : > { %514 = vmatpush.bf16.msra.mxu1 %v1517_v9  ;;  %vm1277_vm5 = vcmask 130048   ;;  %s1296_s1 = sshll.u32 %s447_s8, 4  ;;  %s1298_s24 = sshll.u32 %s1294_s22, 4  ;;  %vm1279_vm6 = vcmask 195584   ;;  %s1297_s1 = int_to_ptr.vmem [resolvable:$true] %s1296_s1  ;;  %s1299_s24 = int_to_ptr.hbm [resolvable:$true] %s1298_s24 }
  0x50   : > { %s1283_s27 = scalar_lea.sflag [#allocation6], %s2167_s14  ;;  %s1885_s9 = sshra.s32 %s1299_s24, 4  ;;  %s1886_s9 = int_to_ptr.hbm [resolvable:$true] %s1885_s9 }
  0x51   : > { %1484 = vmatmul.msk.bf16.vlgmr.msra.gmra.mxu0 %vm473_vm0, %v455_v6  ;;  %1502 = vmatmul.msk.bf16.vlgmr.msra.gmra.mxu2 %vm473_vm0, %v779_v7  ;;  %s1887_s19 = scalar_lea.hbm %s1886_s9, 8  ;;  %s1891_s6 = scalar_lea.hbm %s2452_s7, 16 }
  0x52   : > { %1493 = vmatmul.msk.bf16.vlgmr.msra.gmra.mxu1 %vm473_vm0, %v455_v6  ;;  %p1888_p1 = scmp.ne.s32.totalorder %s1886_s9, %s1887_s19  ;;  %p1892_p6 = scmp.lt.s32.totalorder %s1886_s9, %s2452_s7 }
  0x53   : > { %p1893_p8 = scmp.lt.s32.totalorder %s1891_s6, %s1887_s19 }
  0x54   : > { %p1889_p3 = pnand %p1888_p1, %p2109_p2 }
  0x55   : > { %p1894_p10 = por %p1893_p8, %p1892_p6 }
  0x56   : > { %p1890_p5 = pneg %p1889_p3 }
  0x58   : > { %p1895_p11 = pnand %p1894_p10, %p1890_p5 }
  0xce   : > { %v486_v12 = vpop.f32.mrf.mxu0 }
  0xcf   : > { %v2196_v13 = vadd.f32 %v486_v12, %v460_v11  ;;  %v516_v21 = vpop.f32.mrf.mxu1 }
  0xd0   : > { %v2201_v22 = vadd.f32 %v516_v21, %v494_v20 }
  0xd1   : > { %527 = vrot.lane.b32.xlu1 %v2196_v13, %s1973_s30  ;;  %521 = vrot.lane.b32.xlu0 %v2196_v13, %s1974_s12  ;;  %v533_v46 = vrot.slane %v2196_v13, 4 }
  0xd4   : > { %v810_v15 = vpop.f32.mrf.mxu2 }
  0xd5   : > { %v811_v16 = vadd.f32 %v810_v15, %v784_v14 }
  0xd6   : > { %v488_v17 = vpop.f32.mrf.mxu0 }
  0xd7   : > { %v814_v18 = vmul.f32 0.35355338, %v811_v16  ;;  %v518_v24 = vpop.f32.mrf.mxu1 }
  0xd9   : > { %819 = vrot.lane.b32.xlu2 %v814_v18, %s1975_s10  ;;  %816 = vrot.lane.b32.xlu1 %v814_v18, %s1974_s12  ;;  %v828_v31 = vrot.slane %v814_v18, 4 }
  0xda   : > { %524 = vrot.lane.b32.xlu0 %v2196_v13, %s1975_s10 }
  0xdc   : > { %v812_v19 = vpop.f32.mrf.mxu2 }
  0xe1   : > { %822 = vrot.lane.b32.xlu2 %v814_v18, %s1973_s30  ;;  %645 = vrot.lane.b32.xlu1 %v2201_v22, %s1975_s10 }
  0xe2   : > { %642 = vrot.lane.b32.xlu0 %v2201_v22, %s1974_s12 }
  0xe9   : > { %648 = vrot.lane.b32.xlu2 %v2201_v22, %s1973_s30 }
 0x133   : > { %v820_v23 = vpop.permute.xlu2 %819 }
 0x134   : > { %v825_v27 = vrot.slane %v820_v23, 4  ;;  %v829_v35 = vsel %vm531_vm1, %v820_v23, %v828_v31 }
 0x135   : > { %v837_v42 = vperm.slane %v829_v35, %v2206_v33 }
 0x136   : > { %v827_v34 = vsel %vm531_vm1, %v825_v27, %v814_v18 }
 0x137   : > { %v833_v40 = vperm.slane %v827_v34, %v2206_v33  ;;  %v864_v56 = vrot.slane %v837_v42, 4 }
 0x139   : > { %v852_v52 = vrot.slane %v833_v40, 4 }
 0x13b   : > { %v823_v37 = vpop.permute.xlu2 %822 }
 0x13c   : > { %v838_v44 = vrot.slane %v823_v37, 4 }
 0x143   : > { %v528_v28 = vpop.permute.xlu1 %527  ;;  %v522_v29 = vpop.permute.xlu0 %521 }
 0x144   : > { %v543_v30 = vrot.slane %v528_v28, 4  ;;  %v545_v32 = vrot.slane %v522_v29, 4 }
 0x146   : > { %v544_v36 = vsel %vm531_vm1, %v543_v30, %v522_v29  ;;  %v546_v41 = vsel %vm531_vm1, %v528_v28, %v545_v32 }
 0x147   : > { %v550_v43 = vperm.slane %v544_v36, %v2206_v33  ;;  %v554_v47 = vperm.slane %v546_v41, %v2206_v33 }
 0x149   : > { %v555_v57 = vrot.slane %v550_v43, 4  ;;  %v567_v0 = vrot.slane %v554_v47, 4 }
 0x14b   : > { %v817_v45 = vpop.permute.xlu1 %816 }
 0x14c   : > { %v839_v49 = vsel %vm531_vm1, %v838_v44, %v817_v45  ;;  %v840_v50 = vrot.slane %v817_v45, 4  ;;  %v525_v51 = vpop.permute.xlu0 %524 }
 0x14d   : > { %v845_v53 = vperm.slane %v839_v49, %v2206_v33  ;;  %v530_v54 = vrot.slane %v525_v51, 4  ;;  %v534_v55 = vsel %vm531_vm1, %v525_v51, %v533_v46 }
 0x14e   : > { %v841_v58 = vsel %vm531_vm1, %v823_v37, %v840_v50  ;;  %v542_v59 = vperm.slane %v534_v55, %v2206_v33 }
 0x14f   : > { %v849_v60 = vperm.slane %v841_v58, %v2206_v33  ;;  %v850_v61 = vrot.slane %v845_v53, 4  ;;  %v853_v62 = vsel %vm531_vm1, %v845_v53, %v852_v52  ;;  %v532_v63 = vsel %vm531_vm1, %v530_v54, %v2196_v13 }
 0x150   : > { %v861_v1 = vperm.slane %v853_v62, %v2217_v48  ;;  %v538_v2 = vperm.slane %v532_v63, %v2206_v33  ;;  %v569_v3 = vrot.slane %v542_v59, 4  ;;  %v568_v9 = vsel %vm531_vm1, %v567_v0, %v542_v59 }
 0x151   : > { %v851_v4 = vsel %vm531_vm1, %v850_v61, %v833_v40  ;;  %v862_v5 = vrot.slane %v849_v60, 4  ;;  %v865_v6 = vsel %vm531_vm1, %v849_v60, %v864_v56  ;;  %v574_v19 = vperm.slane %v568_v9, %v2217_v48 }
 0x152   : > { %v873_v7 = vperm.slane %v865_v6, %v2217_v48  ;;  %v556_v8 = vsel %vm531_vm1, %v555_v57, %v538_v2  ;;  %v857_v10 = vperm.slane %v851_v4, %v2217_v48  ;;  %v557_v12 = vrot.slane %v538_v2, 4 }
 0x153   : > { %v863_v11 = vsel %vm531_vm1, %v862_v5, %v837_v42  ;;  %v570_v13 = vsel %vm531_vm1, %v554_v47, %v569_v3  ;;  %v876_v14 = vrot.slane %v861_v1, 4  ;;  %v562_v16 = vperm.slane %v556_v8, %v2217_v48 }
 0x154   : > { %v558_v15 = vsel %vm531_vm1, %v550_v43, %v557_v12  ;;  %v869_v17 = vperm.slane %v863_v11, %v2217_v48  ;;  %v880_v18 = vrot.slane %v873_v7, 4  ;;  %v578_v20 = vperm.slane %v570_v13, %v2217_v48 }
 0x155   : > { %v874_v21 = vrot.slane %v857_v10, 4  ;;  %v566_v23 = vperm.slane %v558_v15, %v2217_v48  ;;  %v877_v24 = vsel %vm531_vm1, 0.0, %v876_v14  ;;  %v882_v25 = vsel %vm531_vm1, %v876_v14, %v857_v10 }
 0x156   : > { %v579_v26 = vrot.slane %v562_v16, 4  ;;  %v878_v28 = vrot.slane %v869_v17, 4  ;;  %v881_v29 = vsel %vm531_vm1, 0.0, %v880_v18  ;;  %v583_v30 = vrot.slane %v574_v19, 4 }
 0x157   : > { %v581_v27 = vrot.slane %v566_v23, 4  ;;  %v585_v31 = vrot.slane %v578_v20, 4  ;;  %v875_v32 = vsel %vm531_vm1, 0.0, %v874_v21  ;;  %v887_v34 = vrot.slane %v877_v24, 4 }
 0x158   : > { %v898_v41 = vrot.slane %v881_v29, 4  ;;  %v580_v42 = vsel %vm531_vm1, 0.0, %v579_v26  ;;  %v879_v45 = vsel %vm531_vm1, 0.0, %v878_v28  ;;  %v584_v46 = vsel %vm531_vm1, 0.0, %v583_v30 }
 0x159   : > { %v582_v35 = vsel %vm531_vm1, 0.0, %v581_v27  ;;  %v587_v36 = vsel %vm531_vm1, %v581_v27, %v562_v16  ;;  %v586_v37 = vsel %vm531_vm1, 0.0, %v585_v31  ;;  %v598_v40 = vsel %vm531_vm1, %v585_v31, %v574_v19 }
 0x15a   : > { %v591_v38 = vperm.slane %v587_v36, %v2206_v33  ;;  %v592_v39 = vrot.slane %v582_v35, 4  ;;  %v602_v43 = vperm.slane %v598_v40, %v2206_v33  ;;  %v603_v44 = vrot.slane %v586_v37, 4 }
 0x15b   : > { %v893_v50 = vsel %vm531_vm1, %v880_v18, %v869_v17  ;;  %v888_v54 = vsel %vm531_vm1, %v887_v34, %v875_v32  ;;  %v886_v56 = vperm.slane %v882_v25, %v2206_v33  ;;  %v899_v57 = vsel %vm531_vm1, %v898_v41, %v879_v45 }
 0x15c   : > { %v593_v47 = vsel %vm531_vm1, %v592_v39, %v580_v42  ;;  %v611_v49 = vrot.slane %v591_v38, 4  ;;  %v604_v52 = vsel %vm531_vm1, %v603_v44, %v584_v46  ;;  %v623_v53 = vrot.slane %v602_v43, 4 }
 0x15d   : > { %v597_v51 = vperm.slane %v593_v47, %v2206_v33  ;;  %v608_v55 = vperm.slane %v604_v52, %v2206_v33  ;;  %v897_v60 = vperm.slane %v893_v50, %v2206_v33  ;;  %v892_v0 = vperm.slane %v888_v54, %v2206_v33  ;;  %v649_v54 = vpop.permute.xlu2 %648 }
 0x15e   : > { %v903_v6 = vperm.slane %v899_v57, %v2206_v33  ;;  %v906_v7 = vrot.slane %v886_v56, 4  ;;  %v646_v57 = vpop.permute.xlu1 %645 }
 0x15f   : > { %v609_v58 = vrot.slane %v597_v51, 4  ;;  %v612_v59 = vsel %vm531_vm1, %v597_v51, %v611_v49  ;;  %v621_v62 = vrot.slane %v608_v55, 4  ;;  %v624_v63 = vsel %vm531_vm1, %v608_v55, %v623_v53 }
 0x160   : > { %v620_v61 = vperm.slane %v612_v59, %v2217_v48  ;;  %v632_v2 = vperm.slane %v624_v63, %v2217_v48  ;;  %v918_v12 = vrot.slane %v897_v60, 4  ;;  %v904_v16 = vrot.slane %v892_v0, 4 }
 0x161   : > { %v610_v1 = vsel %vm531_vm1, %v609_v58, %v591_v38  ;;  %v622_v4 = vsel %vm531_vm1, %v621_v62, %v602_v43  ;;  %v916_v19 = vrot.slane %v903_v6, 4  ;;  %v907_v23 = vsel %vm531_vm1, %v892_v0, %v906_v7  ;;  %v643_v58 = vpop.permute.xlu0 %642 }
 0x162   : > { %v616_v3 = vperm.slane %v610_v1, %v2217_v48  ;;  %v639_v5 = vrot.slane %v620_v61, 4  ;;  %v628_v8 = vperm.slane %v622_v4, %v2217_v48  ;;  %v637_v9 = vrot.slane %v632_v2, 4 }
 0x163   : > { %v919_v25 = vsel %vm531_vm1, %v903_v6, %v918_v12  ;;  %v905_v26 = vsel %vm531_vm1, %v904_v16, %v886_v56  ;;  %v915_v27 = vperm.slane %v907_v23, %v2217_v48  ;;  %v917_v28 = vsel %vm531_vm1, %v916_v19, %v897_v60 }
 0x164   : > { %v635_v10 = vrot.slane %v616_v3, 4  ;;  %v640_v11 = vsel %vm531_vm1, %v632_v2, %v639_v5  ;;  %v633_v13 = vrot.slane %v628_v8, 4  ;;  %v638_v14 = vsel %vm531_vm1, %v637_v9, %v620_v61 }
 0x165   : > { %v764_v15 = vpack.c.bf16 %v640_v11, %v640_v11  ;;  %v763_v18 = vpack.c.bf16 %v638_v14, %v638_v14  ;;  %v927_v29 = vperm.slane %v919_v25, %v2217_v48  ;;  %v911_v30 = vperm.slane %v905_v26, %v2217_v48 }
 0x166   : > { %v636_v17 = vsel %vm531_vm1, %v628_v8, %v635_v10  ;;  %v634_v20 = vsel %vm531_vm1, %v633_v13, %v616_v3  ;;  %v923_v31 = vperm.slane %v917_v28, %v2217_v48  ;;  %v934_v34 = vrot.slane %v915_v27, 4 }
 0x167   : > { %v762_v21 = vpack.c.bf16 %v636_v17, %v636_v17  ;;  %769 = vst.msk [vmem:[#allocation2 + $0xc] sm:$0xf] %vm765_vm2, %v764_v15  ;;  %v761_v24 = vpack.c.bf16 %v634_v20, %v634_v20  ;;  %v932_v37 = vrot.slane %v927_v29, 4  ;;  %v930_v40 = vrot.slane %v911_v30, 4 }
 0x168   : > { %768 = vst.msk [vmem:[#allocation2 + $0x8] sm:$0xf] %vm765_vm2, %v763_v18  ;;  %v928_v43 = vrot.slane %v923_v31, 4  ;;  %v935_v45 = vsel %vm531_vm1, %v927_v29, %v934_v34  ;;  %v653_v55 = vrot.slane %v2201_v22, 4  ;;  %v663_v56 = vrot.slane %v649_v54, 4 }
 0x169   : > { %767 = vst.msk [vmem:[#allocation2 + $0x4] sm:$0xf] %vm765_vm2, %v762_v21  ;;  %v933_v46 = vsel %vm531_vm1, %v932_v37, %v915_v27  ;;  %v931_v47 = vsel %vm531_vm1, %v923_v31, %v930_v40  ;;  %v939_v50 = vpack.c.bf16 %v935_v45, %v935_v45  ;;  %v651_v59 = vrot.slane %v646_v57, 4 }
 0x16a   : > { %766 = vst.msk [vmem:[#allocation2] sm:$0xf] %vm765_vm2, %v761_v24  ;;  %v929_v49 = vsel %vm531_vm1, %v928_v43, %v911_v30  ;;  %v938_v51 = vpack.c.bf16 %v933_v46, %v933_v46  ;;  %v937_v52 = vpack.c.bf16 %v931_v47, %v931_v47  ;;  %v654_v60 = vsel %vm531_vm1, %v646_v57, %v653_v55 }
 0x16b   : > { %v936_v53 = vpack.c.bf16 %v929_v49, %v929_v49  ;;  %v665_v61 = vrot.slane %v643_v58, 4  ;;  %v664_v62 = vsel %vm531_vm1, %v663_v56, %v643_v58  ;;  %v662_v63 = vperm.slane %v654_v60, %v2206_v33 }
 0x16c   : > { %v670_v0 = vperm.slane %v664_v62, %v2206_v33  ;;  %v652_v1 = vsel %vm531_vm1, %v651_v59, %v2201_v22 }
 0x16d   : > { %v666_v2 = vsel %vm531_vm1, %v649_v54, %v665_v61  ;;  %v658_v3 = vperm.slane %v652_v1, %v2206_v33  ;;  %v689_v4 = vrot.slane %v662_v63, 4 }
 0x16e   : > { %v943_v32 = vld [vmem:[#allocation2 + $0xc] sm:$0xf]  ;;  %v674_v5 = vperm.slane %v666_v2, %v2206_v33  ;;  %v675_v6 = vrot.slane %v670_v0, 4 }
 0x16f   : > { %v942_v35 = vld [vmem:[#allocation2 + $0x8] sm:$0xf]  ;;  %v1010_v36 = vsel %vm948_vm3, %v943_v32, 0  ;;  %v677_v7 = vrot.slane %v658_v3, 4 }
 0x170   : > { %v991_v38 = vsel %vm948_vm3, %v942_v35, 0  ;;  %1019 = vmatpush.bf16.xpose.msrb.mxu2 %v1010_v36  ;;  %v941_v39 = vld [vmem:[#allocation2 + $0x4] sm:$0xf]  ;;  %v676_v8 = vsel %vm531_vm1, %v675_v6, %v658_v3  ;;  %v687_v9 = vrot.slane %v674_v5, 4  ;;  %v690_v10 = vsel %vm531_vm1, %v674_v5, %v689_v4  ;;  %v1644_v5 = vld [vmem:[%s387_s21] ss:$0 sm:$0xff] }
 0x171   : > { %1000 = vmatpush.bf16.xpose.msrb.mxu1 %v991_v38  ;;  %v940_v41 = vld [vmem:[#allocation2] sm:$0xf]  ;;  %v972_v42 = vsel %vm948_vm3, %v941_v39, 0  ;;  %v682_v11 = vperm.slane %v676_v8, %v2217_v48  ;;  %v698_v12 = vperm.slane %v690_v10, %v2217_v48  ;;  %v678_v22 = vsel %vm531_vm1, %v670_v0, %v677_v7 }
 0x172   : > { %v953_v44 = vsel %vm948_vm3, %v940_v41, 0  ;;  %981 = vmatpush.bf16.xpose.msrb.mxu0 %v972_v42  ;;  %v688_v13 = vsel %vm531_vm1, %v687_v9, %v662_v63  ;;  %v686_v14 = vperm.slane %v678_v22, %v2217_v48 }
 0x173   : > { %962 = vmatpush.bf16.xpose.msra.mxu3 %v953_v44  ;;  %v694_v15 = vperm.slane %v688_v13, %v2217_v48  ;;  %v699_v16 = vrot.slane %v682_v11, 4  ;;  %v705_v17 = vrot.slane %v698_v12, 4 }
 0x174   : > { %v701_v18 = vrot.slane %v686_v14, 4 }
 0x175   : > { %v703_v19 = vrot.slane %v694_v15, 4  ;;  %v706_v20 = vsel %vm531_vm1, 0.0, %v705_v17  ;;  %v700_v21 = vsel %vm531_vm1, 0.0, %v699_v16  ;;  %v718_v23 = vsel %vm531_vm1, %v705_v17, %v694_v15 }
 0x176   : > { %v723_v24 = vrot.slane %v706_v20, 4  ;;  %v702_v25 = vsel %vm531_vm1, 0.0, %v701_v18  ;;  %v707_v27 = vsel %vm531_vm1, %v701_v18, %v682_v11  ;;  %v722_v28 = vperm.slane %v718_v23, %v2206_v33 }
 0x177   : > { %1506 = vmatmul.msk.bf16.vlgmr.msrb.gmra.mxu2 %vm948_vm3, %v939_v50  ;;  %v704_v26 = vsel %vm531_vm1, 0.0, %v703_v19  ;;  %v711_v29 = vperm.slane %v707_v27, %v2206_v33  ;;  %v712_v30 = vrot.slane %v702_v25, 4 }
 0x178   : > { %1505 = vmatmul.msk.bf16.vlgmr.msrb.gmra.mxu1 %vm948_vm3, %v938_v51  ;;  %v724_v31 = vsel %vm531_vm1, %v723_v24, %v704_v26  ;;  %v743_v34 = vrot.slane %v722_v28, 4 }
 0x179   : > { %1504 = vmatmul.msk.bf16.vlgmr.msrb.gmra.mxu0 %vm948_vm3, %v937_v52  ;;  %v728_v32 = vperm.slane %v724_v31, %v2206_v33  ;;  %v713_v35 = vsel %vm531_vm1, %v712_v30, %v700_v21  ;;  %v731_v36 = vrot.slane %v711_v29, 4 }
 0x17a   : > { %1503 = vmatmul.msk.bf16.vlgmr.msra.gmra.mxu3 %vm948_vm3, %v936_v53  ;;  %v717_v37 = vperm.slane %v713_v35, %v2206_v33 }
 0x17b   : > { %v741_v38 = vrot.slane %v728_v32, 4  ;;  %v744_v39 = vsel %vm531_vm1, %v728_v32, %v743_v34 }
 0x17c   : > { %v752_v40 = vperm.slane %v744_v39, %v2217_v48  ;;  %v729_v41 = vrot.slane %v717_v37, 4  ;;  %v732_v42 = vsel %vm531_vm1, %v717_v37, %v731_v36 }
 0x17d   : > { %v742_v43 = vsel %vm531_vm1, %v741_v38, %v722_v28  ;;  %v740_v44 = vperm.slane %v732_v42, %v2217_v48 }
 0x17e   : > { %v748_v45 = vperm.slane %v742_v43, %v2217_v48  ;;  %v757_v46 = vrot.slane %v752_v40, 4  ;;  %v730_v47 = vsel %vm531_vm1, %v729_v41, %v711_v29 }
 0x17f   : > { %v736_v49 = vperm.slane %v730_v47, %v2217_v48  ;;  %v759_v52 = vrot.slane %v740_v44, 4 }
 0x180   : > { %v753_v50 = vrot.slane %v748_v45, 4  ;;  %v758_v51 = vsel %vm531_vm1, %v757_v46, %v740_v44 }
 0x181   : > { %v772_v53 = vpack.c.bf16 %v758_v51, %v758_v51  ;;  %v755_v55 = vrot.slane %v736_v49, 4  ;;  %v760_v56 = vsel %vm531_vm1, %v752_v40, %v759_v52 }
 0x182   : > { %v754_v54 = vsel %vm531_vm1, %v753_v50, %v736_v49  ;;  %v773_v58 = vpack.c.bf16 %v760_v56, %v760_v56 }
 0x183   : > { %v770_v57 = vpack.c.bf16 %v754_v54, %v754_v54  ;;  %776 = vst.msk [vmem:[#allocation3 + $0x8] sm:$0xf] %vm765_vm2, %v772_v53  ;;  %v756_v59 = vsel %vm531_vm1, %v748_v45, %v755_v55 }
 0x184   : > { %v771_v60 = vpack.c.bf16 %v756_v59, %v756_v59  ;;  %777 = vst.msk [vmem:[#allocation3 + $0xc] sm:$0xf] %vm765_vm2, %v773_v58 }
 0x185   : > { %774 = vst.msk [vmem:[#allocation3] sm:$0xf] %vm765_vm2, %v770_v57 }
 0x186   : > { %775 = vst.msk [vmem:[#allocation3 + $0x4] sm:$0xf] %vm765_vm2, %v771_v60 }
 0x18a   : > { %v1067_v0 = vld [vmem:[#allocation3 + $0x8] sm:$0xf] }
 0x18b   : > { %v1112_v2 = vsel %vm1072_vm4, %v1067_v0, 0  ;;  %v1068_v3 = vld [vmem:[#allocation3 + $0xc] sm:$0xf] }
 0x18c   : > { %v1065_v61 = vld [vmem:[#allocation3] sm:$0xf]  ;;  %1121 = vmatpush.bf16.msra.mxu1 %v1112_v2  ;;  %v1131_v4 = vsel %vm1072_vm4, %v1068_v3, 0 }
 0x18d   : > { %v1074_v62 = vsel %vm1072_vm4, %v1065_v61, 0  ;;  %v1066_v63 = vld [vmem:[#allocation3 + $0x4] sm:$0xf]  ;;  %1140 = vmatpush.bf16.msra.mxu2 %v1131_v4 }
 0x18e   : > { %1083 = vmatpush.bf16.msrb.mxu3 %v1074_v62  ;;  %v1093_v1 = vsel %vm1072_vm4, %v1066_v63, 0 }
 0x18f   : > { %1102 = vmatpush.bf16.msra.mxu0 %v1093_v1 }
 0x1f5   : > { %v1002_v6 = vpop.f32.mrf.mxu1 }
 0x1f6   : > { %v1003_v7 = vadd.f32 %v1644_v5, %v1002_v6  ;;  %v983_v8 = vpop.f32.mrf.mxu0 }
 0x1f7   : > { %v984_v12 = vadd.f32 %v1644_v5, %v983_v8 }
 0x1f8   : > { %v1031_v9 = vsel %vm948_vm3, %v1003_v7, -inf }
 0x1f9   : > { %1032 = vmax.xlane.f32.xlu2 %v1031_v9  ;;  %v1028_v17 = vsel %vm948_vm3, %v984_v12, -inf }
 0x1fa   : > { %v1021_v10 = vpop.f32.mrf.mxu2 }
 0x1fb   : > { %v1022_v11 = vadd.f32 %v1644_v5, %v1021_v10 }
 0x1fd   : > { %v964_v22 = vpop.f32.mrf.mxu3  ;;  %v1004_v13 = vpop.f32.mrf.mxu1  ;;  %v1034_v14 = vsel %vm948_vm3, %v1022_v11, -inf }
 0x1fe   : > { %v965_v15 = vadd.f32 %v1644_v5, %v964_v22  ;;  %1035 = vmax.xlane.f32.xlu1 %v1034_v14  ;;  %v985_v16 = vpop.f32.mrf.mxu0 }
 0x200   : > { %v1025_v18 = vsel %vm948_vm3, %v965_v15, -inf }
 0x201   : > { %1029 = vmax.xlane.f32.xlu2 %v1028_v17  ;;  %1026 = vmax.xlane.f32.xlu0 %v1025_v18 }
 0x202   : > { %v1023_v19 = vpop.f32.mrf.mxu2 }
 0x205   : > { %v966_v20 = vpop.f32.mrf.mxu3 }
 0x26c   : > { %v1033_v21 = vpop.xlane.xlu2 %1032 }
 0x26d   : > { %v1039_v23 = vsub.f32 %v1003_v7, %v1033_v21 }
 0x26f   : > { %v1045_v24 = vmul.f32 1.442695, %v1039_v23 }
 0x271   : > { %1645 = vpow2.f32 %v1045_v24  ;;  %v1036_v25 = vpop.xlane.xlu1 %1035 }
 0x272   : > { %v1040_v26 = vsub.f32 %v1022_v11, %v1036_v25 }
 0x274   : > { %v1047_v27 = vmul.f32 1.442695, %v1040_v26  ;;  %v1030_v28 = vpop.xlane.xlu2 %1029  ;;  %v1027_v29 = vpop.xlane.xlu0 %1026 }
 0x275   : > { %v1038_v30 = vsub.f32 %v984_v12, %v1030_v28  ;;  %v1037_v31 = vsub.f32 %v965_v15, %v1027_v29 }
 0x276   : > { %1647 = vpow2.f32 %v1047_v27 }
 0x277   : > { %v1646_v32 = vpop.eup %1645  ;;  %v1043_v34 = vmul.f32 1.442695, %v1038_v30  ;;  %v1041_v35 = vmul.f32 1.442695, %v1037_v31 }
 0x278   : > { %v1063_v36 = vpack.c.bf16 %v1646_v32, %v1646_v32  ;;  %v1055_v37 = vsel %vm948_vm3, %v1646_v32, 0.0 }
 0x279   : > { %1649 = vpow2.f32 %v1043_v34  ;;  %1056 = vadd.xlane.f32.xlu0 %v1055_v37 }
 0x27a   : > { %1651 = vpow2.f32 %v1041_v35  ;;  %1509 = vmatmul.msk.bf16.vlgmr.msra.gmra.mxu1 %vm948_vm3, %v1063_v36 }
 0x27c   : > { %v1648_v38 = vpop.eup %1647 }
 0x27d   : > { %v1064_v39 = vpack.c.bf16 %v1648_v38, %v1648_v38  ;;  %v1058_v40 = vsel %vm948_vm3, %v1648_v38, 0.0 }
 0x27e   : > { %1059 = vadd.xlane.f32.xlu2 %v1058_v40 }
 0x27f   : > { %v1650_v41 = vpop.eup %1649  ;;  %1510 = vmatmul.msk.bf16.vlgmr.msra.gmra.mxu2 %vm948_vm3, %v1064_v39 }
 0x280   : > { %v1652_v42 = vpop.eup %1651  ;;  %v1062_v43 = vpack.c.bf16 %v1650_v41, %v1650_v41  ;;  %v1052_v44 = vsel %vm948_vm3, %v1650_v41, 0.0 }
 0x281   : > { %1053 = vadd.xlane.f32.xlu0 %v1052_v44  ;;  %v1049_v45 = vsel %vm948_vm3, %v1652_v42, 0.0  ;;  %v1061_v46 = vpack.c.bf16 %v1652_v42, %v1652_v42 }
 0x282   : > { %1050 = vadd.xlane.f32.xlu1 %v1049_v45  ;;  %1508 = vmatmul.msk.bf16.vlgmr.msra.gmra.mxu0 %vm948_vm3, %v1062_v43 }
 0x283   : > { %1507 = vmatmul.msk.bf16.vlgmr.msrb.gmra.mxu3 %vm948_vm3, %v1061_v46 }
 0x2ec   : > { %v1057_v47 = vpop.xlane.xlu0 %1056 }
 0x2f1   : > { %v1060_v51 = vpop.xlane.xlu2 %1059 }
 0x2f4   : > { %v1054_v49 = vpop.xlane.xlu0 %1053 }
 0x2f5   : > { %1653 = vrcp.f32 %v1054_v49  ;;  %v1051_v52 = vpop.xlane.xlu1 %1050 }
 0x2f6   : > { %1655 = vrcp.f32 %v1057_v47 }
 0x2f7   : > { %v1123_v50 = vpop.f32.mrf.mxu1  ;;  %1657 = vrcp.f32 %v1060_v51 }
 0x2f8   : > { %1659 = vrcp.f32 %v1051_v52 }
 0x2fb   : > { %v1654_v53 = vpop.eup %1653 }
 0x2fc   : > { %v1656_v57 = vpop.eup %1655 }
 0x2fd   : > { %v1658_v58 = vpop.eup %1657  ;;  %v1152_v60 = vmul.f32 %v1656_v57, %v1123_v50 }
 0x2fe   : > { %v1660_v1 = vpop.eup %1659 }
 0x2ff   : > { %v1104_v54 = vpop.f32.mrf.mxu0  ;;  %v1125_v55 = vpop.f32.mrf.mxu1  ;;  %v1154_v4 = vrot.slane %v1152_v60, 4 }
 0x300   : > { %v1151_v56 = vmul.f32 %v1654_v53, %v1104_v54 }
 0x302   : > { %v1142_v59 = vpop.f32.mrf.mxu2  ;;  %v1168_v61 = vrot.slane %v1151_v56, 4 }
 0x303   : > { %v1153_v62 = vmul.f32 %v1658_v58, %v1142_v59 }
 0x305   : > { %v1166_v63 = vrot.slane %v1153_v62, 4  ;;  %v1169_v0 = vsel %vm531_vm1, %v1153_v62, %v1168_v61 }
 0x306   : > { %v1085_v2 = vpop.f32.mrf.mxu3  ;;  %v1177_v3 = vperm.slane %v1169_v0, %v2206_v33 }
 0x307   : > { %v1150_v5 = vmul.f32 %v1660_v1, %v1085_v2  ;;  %v1167_v6 = vsel %vm531_vm1, %v1166_v63, %v1151_v56  ;;  %v1106_v7 = vpop.f32.mrf.mxu0 }
 0x308   : > { %v1173_v8 = vperm.slane %v1167_v6, %v2206_v33  ;;  %v1190_v22 = vrot.slane %v1177_v3, 4 }
 0x309   : > { %v1155_v9 = vsel %vm531_vm1, %v1154_v4, %v1150_v5  ;;  %v1156_v10 = vrot.slane %v1150_v5, 4 }
 0x30a   : > { %v1161_v11 = vperm.slane %v1155_v9, %v2206_v33  ;;  %v1178_v12 = vrot.slane %v1173_v8, 4  ;;  %v1144_v13 = vpop.f32.mrf.mxu2 }
 0x30b   : > { %v1157_v14 = vsel %vm531_vm1, %v1152_v60, %v1156_v10 }
 0x30c   : > { %v1165_v15 = vperm.slane %v1157_v14, %v2206_v33  ;;  %v1180_v16 = vrot.slane %v1161_v11, 4  ;;  %v1179_v17 = vsel %vm531_vm1, %v1178_v12, %v1161_v11 }
 0x30d   : > { %v1185_v18 = vperm.slane %v1179_v17, %v2217_v48 }
 0x30e   : > { %v1192_v19 = vrot.slane %v1165_v15, 4  ;;  %v1181_v20 = vsel %vm531_vm1, %v1173_v8, %v1180_v16  ;;  %v1191_v21 = vsel %vm531_vm1, %v1190_v22, %v1165_v15  ;;  %v1087_v23 = vpop.f32.mrf.mxu3 }
 0x30f   : > { %v1189_v24 = vperm.slane %v1181_v20, %v2217_v48  ;;  %v1197_v25 = vperm.slane %v1191_v21, %v2217_v48  ;;  %v1202_v26 = vrot.slane %v1185_v18, 4 }
 0x310   : > { %v1193_v27 = vsel %vm531_vm1, %v1177_v3, %v1192_v19 }
 0x311   : > { %v1201_v28 = vperm.slane %v1193_v27, %v2217_v48  ;;  %v1204_v29 = vrot.slane %v1189_v24, 4  ;;  %v1206_v30 = vrot.slane %v1197_v25, 4  ;;  %v1203_v34 = vsel %vm531_vm1, 0.0, %v1202_v26 }
 0x313   : > { %v1205_v31 = vsel %vm531_vm1, 0.0, %v1204_v29  ;;  %v1208_v32 = vrot.slane %v1201_v28, 4  ;;  %v1210_v35 = vsel %vm531_vm1, %v1204_v29, %v1185_v18  ;;  %v1207_v44 = vsel %vm531_vm1, 0.0, %v1206_v30 }
 0x314   : > { %v1215_v36 = vrot.slane %v1205_v31, 4  ;;  %v1214_v37 = vperm.slane %v1210_v35, %v2206_v33 }
 0x315   : > { %v1209_v38 = vsel %vm531_vm1, 0.0, %v1208_v32  ;;  %v1221_v39 = vsel %vm531_vm1, %v1208_v32, %v1197_v25 }
 0x316   : > { %v1226_v40 = vrot.slane %v1209_v38, 4  ;;  %v1216_v41 = vsel %vm531_vm1, %v1215_v36, %v1203_v34  ;;  %v1225_v42 = vperm.slane %v1221_v39, %v2206_v33  ;;  %v1234_v43 = vrot.slane %v1214_v37, 4 }
 0x317   : > { %v1220_v45 = vperm.slane %v1216_v41, %v2206_v33 }
 0x318   : > { %v1227_v46 = vsel %vm531_vm1, %v1226_v40, %v1207_v44  ;;  %v1246_v47 = vrot.slane %v1225_v42, 4 }
 0x319   : > { %v1231_v49 = vperm.slane %v1227_v46, %v2206_v33  ;;  %v1235_v50 = vsel %vm531_vm1, %v1220_v45, %v1234_v43  ;;  %v1232_v51 = vrot.slane %v1220_v45, 4 }
 0x31a   : > { %v1243_v52 = vperm.slane %v1235_v50, %v2217_v48 }
 0x31b   : > { %v1247_v53 = vsel %vm531_vm1, %v1231_v49, %v1246_v47  ;;  %v1233_v54 = vsel %vm531_vm1, %v1232_v51, %v1214_v37  ;;  %v1244_v55 = vrot.slane %v1231_v49, 4 }
 0x31c   : > { %v1255_v56 = vperm.slane %v1247_v53, %v2217_v48  ;;  %v1262_v57 = vrot.slane %v1243_v52, 4  ;;  %v1239_v58 = vperm.slane %v1233_v54, %v2217_v48 }
 0x31d   : > { %v1245_v59 = vsel %vm531_vm1, %v1244_v55, %v1225_v42 }
 0x31e   : > { %v1263_v33 = vsel %vm531_vm1, %v1255_v56, %v1262_v57  ;;  %v1260_v60 = vrot.slane %v1255_v56, 4  ;;  %v1251_v61 = vperm.slane %v1245_v59, %v2217_v48  ;;  %v1258_v62 = vrot.slane %v1239_v58, 4 }
 0x31f   : > { %1273 = vrot.lane.b32.xlu0 %v1263_v33, %s1978_s3 }
 0x320   : > { %v1261_v63 = vsel %vm531_vm1, %v1260_v60, %v1243_v52  ;;  %v1256_v0 = vrot.slane %v1251_v61, 4  ;;  %v1259_v1 = vsel %vm531_vm1, %v1251_v61, %v1258_v62 }
 0x321   : > { %1269 = vrot.lane.b32.xlu2 %v1261_v63, %s1979_s5  ;;  %1265 = vrot.lane.b32.xlu1 %v1259_v1, %s1980_s18 }
 0x322   : > { %v1257_v2 = vsel %vm531_vm1, %v1256_v0, %v1239_v58 }
 0x37b   : > { %v1270_v3 = vpop.permute.xlu2 %1269 }
 0x391   : > { %v1274_v5 = vpop.permute.xlu0 %1273 }
 0x393   : > { %v1266_v48 = vpop.permute.xlu1 %1265 }
 0x394   : > { %v1276_v4 = vsel %vm948_vm3, %v1257_v2, %v1266_v48 }
 0x395   : > { %v1278_v6 = vsel %vm1277_vm5, %v1276_v4, %v1270_v3 }
 0x396   : > { %v1280_v7 = vsel %vm1279_vm6, %v1278_v6, %v1274_v5 }
 0x397   : > { %1281 = vst.msk [vmem:[%s447_s8] sm:$0xff] %vm473_vm0, %v1280_v7 }
 0x398   : > { %1898 = shalt.err (!%p1895_p11)
}
 0x399   : > { %1543 = dma.vmem_to_hbm [thread:$0]  (%p2109_p2), %s1297_s1, 128, %s1299_s24, %s1283_s27  }
 0x39a PF: > { %s2486_s14 = sld [smem:[#allocation22_spill]] }
 0x39b   : > { %s2488_s17 = sld [smem:[#allocation24_spill]] }
 0x3a0   : > { %s1310_s21 = sand.u32 1, %s2486_s14  }
 0x3a1   : > { %p2489_p12 = scmp.ge.s32.totalorder %s2488_s17, 2  ;;  %s1311_s30 = scalar_lea.sflag [#allocation6], %s1310_s21 }
 0x3a3   : > { %p1569_p13 = pnand %p2489_p12, %p2116_p7 }
 0x3a5   : > { %p1570_p0 = pneg %p1569_p13 }
 0x3a7   : > { %1940 = dma.done.wait (%p1570_p0), %s1311_s30, 128  }
 0x3a8   : > { %1942 = vsyncadd (%p1570_p0), %s1311_s30, 4294967168  ;;  %s28_s29 = sadd.s32 1, %s2488_s17   ;;  %s2490_s12 = sld [smem:[#allocation23_spill]] }
 0x3a9   : > { %p25_p4 = scmp.ge.s32.totalorder %s28_s29, 4   ;;  %s2491_s26 = sld [smem:[#allocation26_spill]] }
 0x3aa   : > { %s2492_s13 = sld [smem:[#allocation25_spill]]  ;;  %s2493_s24 = smov %s1949_s25 }
 0x3ab   : > { %s2495_s27 = smov %s1961_s28 }
 0x3ac   :  { %27 = sbr.rel (!%p25_p4) target bundleno = 16 (0x10), region = 137 }
 0x3ae   : > { %s2494_s25 = smov %s2490_s12 }
 0x3b0   : > { %s2496_s28 = smov %s2492_s13 }
 0x3b1   :  { %1317 = vsyncpa [#allocation5], 1 }
 0x3b2   :  { %1319 = vsyncpa [#allocation5 + $0x1], 1 }
 0x3b3   :  { %1320 = vsyncpa [#allocation8], 1 }
 0x3b4   :  { %1322 = vsyncpa [#allocation8 + $0x1], 1 }
 0x3b5   :  { %1323 = vsyncpa [#allocation11], 1 }
 0x3b6   :  { %1324 = vsyncpa [#allocation14], 1 }
 0x3b7   :  { %1325 = vsyncpa [#allocation6], 1 }
 0x3b8   :  { %1327 = vsyncpa [#allocation6 + $0x1], 1 }

// kernel: tpu_custom_call.1
= control target key start
LH: loop header
LB: loop body
LE: loop exit
PB: predicated region body
PF: predicated region fallthrough
CT: control target
= control target key end

     0   :  { %s2445_s0 = inlined_call_operand.hbm [shape: f32[2,8,32], index: 0, kind: input, shape index: {}]   ;;  %s2446_s1 = inlined_call_operand.hbm [shape: f32[2,8,32], index: 1, kind: input, shape index: {}]   ;;  %s2447_s2 = inlined_call_operand.hbm [shape: f32[2,1,8], index: 2, kind: input, shape index: {}]   ;;  %s2448_s3 = inlined_call_operand.hbm [shape: bf16[32,32], index: 3, kind: input, shape index: {}]   ;;  %s2449_s4 = inlined_call_operand.hbm [shape: bf16[32,32], index: 4, kind: input, shape index: {}]   ;;  %s2450_s5 = inlined_call_operand.hbm [shape: bf16[32,32], index: 5, kind: input, shape index: {}]   ;;  %s2451_s6 = inlined_call_operand.hbm [shape: f32[8,32], index: 6, kind: input, shape index: {}]   ;;  %s2452_s7 = inlined_call_operand.hbm [shape: f32[2,8,32], index: 7, kind: output, shape index: {}]  }
   0x1   :  { %2461 = sst [smem:[#allocation28_spill]] %s2446_s1 }
   0x2   :  { %2462 = sst [smem:[#allocation29_spill]] %s2448_s3 }
   0x3   :  { %2463 = sst [smem:[#allocation30_spill]] %s2449_s4 }
   0x4   :  { %2464 = sst [smem:[#allocation31_spill]] %s2450_s5 }
   0x5   :  { %2465 = sst [smem:[#allocation32_spill]] %s2451_s6 }
   0x6   :  { %12 = vsyncpa [#allocation5], 0 }
   0x7   :  { %14 = vsyncpa [#allocation5 + $0x1], 0 }
   0x8   :  { %15 = vsyncpa [#allocation8], 0 }
   0x9   :  { %17 = vsyncpa [#allocation8 + $0x1], 0 }
   0xa   :  { %18 = vsyncpa [#allocation11], 0 }
   0xb   :  { %19 = vsyncpa [#allocation14], 0 }
   0xc   :  { %20 = vsyncpa [#allocation6], 0 }
   0xd   :  { %22 = vsyncpa [#allocation6 + $0x1], 0  ;;  %s2021_s24 = smov 0   ;;  %s2023_s25 = smov 0  }
   0xe   :  { %s2025_s26 = smov 0   ;;  %s2027_s27 = smov 0  }
   0xf   :  { %s2029_s28 = smov 0   ;;  %s2031_s29 = smov 0  }
  0x10 LB: > { %2466 = sst [smem:[#allocation22_spill]] %s1945_s24  ;;  %s2052_s30 = sadd.s32 4294967295, %s1965_s29   ;;  %s1965_s29 = sphi %s2031_s29, %s28_s29   ;;  %s1961_s28 = sphi %s2029_s28, %s2496_s28   ;;  %s1957_s27 = sphi %s2027_s27, %s2495_s27   ;;  %s1953_s26 = sphi %s2025_s26, %s2491_s26   ;;  %s1949_s25 = sphi %s2023_s25, %s2494_s25   ;;  %s1945_s24 = sphi %s2021_s24, %s2493_s24  }
  0x11   : > { %2467 = sst [smem:[#allocation23_spill]] %s1953_s26  ;;  %p1458_p0 = scmp.ge.s32.totalorder %s1965_s29, 1 }
  0x12   : > { %2468 = sst [smem:[#allocation24_spill]] %s1965_s29  ;;  %p63_p1 = scmp.eq.s32.totalorder %s2052_s30, 0 }
  0x13   : > { %p237_p2 = scmp.lt.s32.totalorder %s1965_s29, 3  ;;  %s2469_s3 = sld [smem:[#allocation29_spill]] }
  0x14   : > { %s1967_s12 = smov [#allocation10]   ;;  %s2472_s5 = sld [smem:[#allocation31_spill]] }
  0x15   : > { %p2060_p3 = pnand %p1458_p0, %p237_p2  ;;  %s250_s13 = sshll.u32 %s1967_s12, 4  ;;  %s251_s13 = int_to_ptr.vmem [resolvable:$true] %s250_s13 }
  0x16   : > { %s2453_s18 = smov 64   ;;  %s2454_s19 = smov 4  }
  0x17   : > { %p1545_p4 = pneg %p2060_p3  ;;  %s1970_s20 = smov [#allocation13]  }
  0x18   : > { %s278_s21 = sshll.u32 %s1970_s20, 4  ;;  %s1457_s22 = sadd.s32 4294967294, %s1965_s29   ;;  %s279_s21 = int_to_ptr.vmem [resolvable:$true] %s278_s21 }
  0x19   : > { %s248_s10 = sshll.u32 %s2469_s3, 4  ;;  %p2068_p5 = pnand %p1545_p4, %p63_p1  ;;  %s249_s10 = int_to_ptr.hbm [resolvable:$true] %s248_s10 }
  0x1a   : > { %s276_s17 = sshll.u32 %s2472_s5, 4  ;;  %s40_s23 = sadd.s32 1, %s1961_s28  ;;  %s277_s17 = int_to_ptr.hbm [resolvable:$true] %s276_s17 }
  0x1b   : > { %1548 = dma.hbm_to_vmem [thread:$0]  (!%p2068_p5), %s249_s10, 256, %s251_s13, [#allocation11], %s2453_s18, %s2453_s18, %s2454_s19  }
  0x1c   : > { %1554 = dma.hbm_to_vmem [thread:$0]  (!%p2068_p5), %s277_s17, 256, %s279_s21, [#allocation14], %s2453_s18, %s2453_s18, %s2454_s19  }
  0x1d   : > { %p42_p7 = scmp.ge.s32.totalorder %s40_s23, 2  ;;  %s49_s8 = sadd.s32 1, %s1953_s26 }
  0x1e   : > { %p56_p8 = scmp.ne.s32.totalorder %s1953_s26, %s1949_s25  ;;  %p57_p9 = scmp.eq.s32.totalorder %s1965_s29, 0 }
  0x1f   : > { %s2498_s23 = smov (%p42_p7, %s40_s23), 0  ;;  %p62_p11 = scmp.ne.s32.totalorder %s1949_s25, %s1945_s24 }
  0x20   : > { %2473 = sst [smem:[#allocation25_spill]] %s2498_s23  ;;  %p2094_p10 = por %p57_p9, %p56_p8 }
  0x21   : > { %s44_s10 = ssub.s32 %s1961_s28, %s2498_s23  ;;  %p224_p12 = scmp.eq.s32.totalorder %s2052_s30, 1 }
  0x22   : > { %p47_p13 = scmp.eq.s32.totalorder %s44_s10, 0  ;;  %p2105_p0 = por %p63_p1, %p62_p11 }
  0x23   : > { %p2109_p2 = por %p224_p12, %p56_p8  ;;  %p230_p4 = scmp.eq.s32.totalorder %s1457_s22, 1 }
  0x24   : > { %s2114_s15 = scalar_select %p47_p13, %s1953_s26, %s49_s8  }
  0x25   : > { %p2116_p7 = por %p230_p4, %p62_p11  ;;  %p1576_p9 = scmp.lt.s32.totalorder %s1965_s29, 2 }
  0x26   : > { %2477 = sst [smem:[#allocation26_spill]] %s2114_s15  ;;  %s2122_s17 = sand.u32 1, %s1953_s26  }
  0x27   : > { %s2478_s16 = scalar_select %p2116_p7, 1, 0 }
  0x28   : > { %s1465_s20 = sshll.u32 %s1961_s28, 3  ;;  %s1464_s21 = sshll.u32 %s2122_s17, 3 }
  0x29   : > { %2479 = sst [smem:[#allocation27_spill]] %s2478_s16  ;;  %p2128_p6 = pnand %p1576_p9, %p2094_p10 }
  0x2a   : > { %s324_s18 = sand.u32 1, %s1965_s29   ;;  %s2481_s1 = sld [smem:[#allocation28_spill]] }
  0x2b   : > { %s328_s3 = scalar_lea.vmem [#allocation7], %s1464_s21  ;;  %s2482_s4 = sld [smem:[#allocation30_spill]] }
  0x2c   : > { %s336_s5 = sshll.u32 %s328_s3, 4  ;;  %s325_s16 = scalar_lea.sflag [#allocation8], %s324_s18  ;;  %s337_s5 = int_to_ptr.vmem [resolvable:$true] %s336_s5 }
  0x2d   : > { %s1971_s29 = smov [#allocation12]   ;;  %s2483_s6 = sld [smem:[#allocation32_spill]] }
  0x2e   : > { %s264_s24 = sshll.u32 %s1971_s29, 4  ;;  %s1972_s26 = smov [#allocation15]   ;;  %s265_s24 = int_to_ptr.vmem [resolvable:$true] %s264_s24 }
  0x2f   : > { %s313_s29 = scalar_lea.hbm %s2445_s0, %s1465_s20  ;;  %s308_s22 = scalar_lea.vmem [#allocation4], %s1464_s21 }
  0x30   : > { %s332_s19 = scalar_lea.hbm %s2481_s1, %s1465_s20  ;;  %s2485_s1 = smov 64  }
  0x31   : > { %s334_s23 = sshll.u32 %s332_s19, 4  ;;  %s262_s9 = sshll.u32 %s2482_s4, 4  ;;  %s335_s23 = int_to_ptr.hbm [resolvable:$true] %s334_s23  ;;  %s263_s9 = int_to_ptr.hbm [resolvable:$true] %s262_s9 }
  0x32   : > { %1564 = dma.hbm_to_vmem [thread:$0]  (!%p2128_p6), %s335_s23, 128, %s337_s5, %s325_s16  }
  0x33   : > { %s291_s3 = sshll.u32 %s2483_s6, 4  ;;  %s2484_s19 = smov 4   ;;  %s292_s3 = int_to_ptr.hbm [resolvable:$true] %s291_s3 }
  0x34   : > { %1551 = dma.hbm_to_vmem [thread:$0]  (!%p2068_p5), %s263_s9, 256, %s265_s24, [#allocation11], %s2485_s1, %s2485_s1, %s2484_s19  }
  0x35   : > { %s293_s5 = sshll.u32 %s1972_s26, 4  ;;  %s315_s15 = sshll.u32 %s313_s29, 4  ;;  %s294_s5 = int_to_ptr.vmem [resolvable:$true] %s293_s5  ;;  %s316_s15 = int_to_ptr.hbm [resolvable:$true] %s315_s15 }
  0x36   : > { %1557 = dma.hbm_to_vmem [thread:$0]  (!%p2068_p5), %s292_s3, 128, %s294_s5, [#allocation14]  }
  0x37   : > { %s317_s8 = sshll.u32 %s308_s22, 4  ;;  %s305_s4 = scalar_lea.sflag [#allocation5], %s2122_s17  ;;  %s318_s8 = int_to_ptr.vmem [resolvable:$true] %s317_s8 }
  0x38   : > { %1561 = dma.hbm_to_vmem [thread:$0]  (!%p2128_p6), %s316_s15, 128, %s318_s8, %s305_s4  }
  0x39   : > { %s349_s24 = scalar_lea.hbm %s2447_s2, %s1961_s28  ;;  %s346_s19 = scalar_lea.vmem [#allocation9], %s2122_s17 }
  0x3a   : > { %s351_s9 = sshll.u32 %s349_s24, 4  ;;  %s353_s26 = sshll.u32 %s346_s19, 4  ;;  %s352_s9 = int_to_ptr.hbm [resolvable:$true] %s351_s9  ;;  %s354_s26 = int_to_ptr.vmem [resolvable:$true] %s353_s26 }
  0x3b   : > { %1567 = dma.hbm_to_vmem [thread:$0]  (!%p2128_p6), %s352_s9, 16, %s354_s26, %s325_s16  }
  0x3c   : > { %362 = sbr.rel (%p2060_p3) target bundleno = 922 (0x39a), region = 48  ;;  %s2167_s14 = sand.u32 (!%p2060_p3), 1, %s1949_s25  }
  0x3d   : > { %s2170_s4 = sshll.u32 (!%p2060_p3), %s2167_s14, 3  ;;  %s365_s6 = scalar_lea.sflag (!%p2060_p3), [#allocation5], %s2167_s14 }
  0x3e   : > { %s368_s20 = scalar_lea.vmem (!%p2060_p3), [#allocation4], %s2170_s4 }
  0x41   : > { %1924 = dma.done.wait (%p2105_p0), %s365_s6, 128  }
  0x42   : > { %1926 = vsyncadd (%p2105_p0), %s365_s6, 4294967168  ;;  %s374_s11 = sand.u32 1, %s2052_s30   ;;  %s378_s17 = scalar_lea.vmem [#allocation7], %s2170_s4 }
  0x43   : > { %s375_s16 = scalar_lea.sflag [#allocation8], %s374_s11 }
  0x44   : > { %1928 = dma.done.wait (%p2105_p0), %s375_s16, 144  }
  0x45   : > { %1930 = vsyncadd (%p2105_p0), %s375_s16, 4294967152  ;;  %s387_s21 = scalar_lea.vmem [#allocation9], %s2167_s14 }
  0x46   : > { %1932 = dma.done.wait (%p63_p1), [#allocation11], 512  }
  0x47   : > { %1934 = vsyncadd (%p63_p1), [#allocation11], 4294966784 }
  0x48   : > { %1936 = dma.done.wait (%p63_p1), [#allocation14], 384  }
  0x49   : > { %1938 = vsyncadd (%p63_p1), [#allocation14], 4294966912  ;;  %v1516_v0 = vld [vmem:[#allocation12 + $0x8] sm:$0xff]  ;;  %v1520_v1 = vld [vmem:[#allocation10 + $0x8] sm:$0xff]  ;;  %vm473_vm0 = vcmask 261120   ;;  %s1973_s30 = smov 104  }
  0x4a   : > { %v1515_v2 = vld [vmem:[#allocation12] sm:$0xff]  ;;  %v1519_v3 = vld [vmem:[#allocation10] sm:$0xff]  ;;  %483 = vmatpush.bf16.msra.mxu0 %v1516_v0  ;;  %807 = vmatpush.bf16.msra.mxu2 %v1520_v1  ;;  %v1518_v8 = vld [vmem:[#allocation13 + $0x8] sm:$0xff]  ;;  %s1974_s12 = smov 120   ;;  %s1975_s10 = smov 112   ;;  %vm531_vm1 = vcmask 1047556  }
  0x4b   : > { %v454_v4 = vld [vmem:[%s378_s17] sm:$0xff]  ;;  %v778_v5 = vld [vmem:[%s368_s20] sm:$0xff]  ;;  %513 = vmatpush.bf16.msra.mxu1 %v1518_v8  ;;  %v1976_v25 = vmov 1983009808   ;;  %v1977_v38 = vmov 1934713408  }
  0x4c   : > { %v455_v6 = vpack.c.bf16 %v454_v4, %v454_v4  ;;  %v779_v7 = vpack.c.bf16 %v778_v5, %v778_v5  ;;  %v1517_v9 = vld [vmem:[#allocation13] sm:$0xff]  ;;  %v449_v10 = vld [vmem:[#allocation15] sm:$0xff]  ;;  %v536_v26 = vunpack.c.l.s4 %v1976_v25  ;;  %v560_v39 = vunpack.c.l.s4 %v1977_v38  ;;  %s1978_s3 = smov 24   ;;  %s1979_s5 = smov 16  }
  0x4d   : > { %v460_v11 = vperm.slane %v449_v10, 1  ;;  %v784_v14 = vperm.slane %v449_v10, 0  ;;  %v494_v20 = vperm.slane %v449_v10, 2  ;;  %vm765_vm2 = vcmask 60416   ;;  %s1980_s18 = smov 8   ;;  %s1512_s23 = sshll.u32 %s1957_s27, 3 }
  0x4e   : > { %484 = vmatpush.bf16.msra.mxu0 %v1515_v2  ;;  %808 = vmatpush.bf16.msra.mxu2 %v1519_v3  ;;  %v2206_v33 = vunpack.c.0.s8 %v536_v26  ;;  %v2217_v48 = vunpack.c.0.s8 %v560_v39  ;;  %vm948_vm3 = vcmask 64512   ;;  %vm1072_vm4 = vcmask 1043456   ;;  %s1294_s22 = scalar_lea.hbm %s2452_s7, %s1512_s23  ;;  %s447_s8 = scalar_lea.vmem [#allocation16], %s2170_s4 }
  0x4f   : > { %514 = vmatpush.bf16.msra.mxu1 %v1517_v9  ;;  %vm1277_vm5 = vcmask 130048   ;;  %s1296_s1 = sshll.u32 %s447_s8, 4  ;;  %s1298_s24 = sshll.u32 %s1294_s22, 4  ;;  %vm1279_vm6 = vcmask 195584   ;;  %s1297_s1 = int_to_ptr.vmem [resolvable:$true] %s1296_s1  ;;  %s1299_s24 = int_to_ptr.hbm [resolvable:$true] %s1298_s24 }
  0x50   : > { %s1283_s27 = scalar_lea.sflag [#allocation6], %s2167_s14  ;;  %s1885_s9 = sshra.s32 %s1299_s24, 4  ;;  %s1886_s9 = int_to_ptr.hbm [resolvable:$true] %s1885_s9 }
  0x51   : > { %1484 = vmatmul.msk.bf16.vlgmr.msra.gmra.mxu0 %vm473_vm0, %v455_v6  ;;  %1502 = vmatmul.msk.bf16.vlgmr.msra.gmra.mxu2 %vm473_vm0, %v779_v7  ;;  %s1887_s19 = scalar_lea.hbm %s1886_s9, 8  ;;  %s1891_s6 = scalar_lea.hbm %s2452_s7, 16 }
  0x52   : > { %1493 = vmatmul.msk.bf16.vlgmr.msra.gmra.mxu1 %vm473_vm0, %v455_v6  ;;  %p1888_p1 = scmp.ne.s32.totalorder %s1886_s9, %s1887_s19  ;;  %p1892_p6 = scmp.lt.s32.totalorder %s1886_s9, %s2452_s7 }
  0x53   : > { %p1893_p8 = scmp.lt.s32.totalorder %s1891_s6, %s1887_s19 }
  0x54   : > { %p1889_p3 = pnand %p1888_p1, %p2109_p2 }
  0x55   : > { %p1894_p10 = por %p1893_p8, %p1892_p6 }
  0x56   : > { %p1890_p5 = pneg %p1889_p3 }
  0x58   : > { %p1895_p11 = pnand %p1894_p10, %p1890_p5 }
  0xce   : > { %v486_v12 = vpop.f32.mrf.mxu0 }
  0xcf   : > { %v2196_v13 = vadd.f32 %v486_v12, %v460_v11  ;;  %v516_v21 = vpop.f32.mrf.mxu1 }
  0xd0   : > { %v2201_v22 = vadd.f32 %v516_v21, %v494_v20 }
  0xd1   : > { %527 = vrot.lane.b32.xlu1 %v2196_v13, %s1973_s30  ;;  %521 = vrot.lane.b32.xlu0 %v2196_v13, %s1974_s12  ;;  %v533_v46 = vrot.slane %v2196_v13, 4 }
  0xd4   : > { %v810_v15 = vpop.f32.mrf.mxu2 }
  0xd5   : > { %v811_v16 = vadd.f32 %v810_v15, %v784_v14 }
  0xd6   : > { %v488_v17 = vpop.f32.mrf.mxu0 }
  0xd7   : > { %v814_v18 = vmul.f32 0.35355338, %v811_v16  ;;  %v518_v24 = vpop.f32.mrf.mxu1 }
  0xd9   : > { %819 = vrot.lane.b32.xlu2 %v814_v18, %s1975_s10  ;;  %816 = vrot.lane.b32.xlu1 %v814_v18, %s1974_s12  ;;  %v828_v31 = vrot.slane %v814_v18, 4 }
  0xda   : > { %524 = vrot.lane.b32.xlu0 %v2196_v13, %s1975_s10 }
  0xdc   : > { %v812_v19 = vpop.f32.mrf.mxu2 }
  0xe1   : > { %822 = vrot.lane.b32.xlu2 %v814_v18, %s1973_s30  ;;  %645 = vrot.lane.b32.xlu1 %v2201_v22, %s1975_s10 }
  0xe2   : > { %642 = vrot.lane.b32.xlu0 %v2201_v22, %s1974_s12 }
  0xe9   : > { %648 = vrot.lane.b32.xlu2 %v2201_v22, %s1973_s30 }
 0x133   : > { %v820_v23 = vpop.permute.xlu2 %819 }
 0x134   : > { %v825_v27 = vrot.slane %v820_v23, 4  ;;  %v829_v35 = vsel %vm531_vm1, %v820_v23, %v828_v31 }
 0x135   : > { %v837_v42 = vperm.slane %v829_v35, %v2206_v33 }
 0x136   : > { %v827_v34 = vsel %vm531_vm1, %v825_v27, %v814_v18 }
 0x137   : > { %v833_v40 = vperm.slane %v827_v34, %v2206_v33  ;;  %v864_v56 = vrot.slane %v837_v42, 4 }
 0x139   : > { %v852_v52 = vrot.slane %v833_v40, 4 }
 0x13b   : > { %v823_v37 = vpop.permute.xlu2 %822 }
 0x13c   : > { %v838_v44 = vrot.slane %v823_v37, 4 }
 0x143   : > { %v528_v28 = vpop.permute.xlu1 %527  ;;  %v522_v29 = vpop.permute.xlu0 %521 }
 0x144   : > { %v543_v30 = vrot.slane %v528_v28, 4  ;;  %v545_v32 = vrot.slane %v522_v29, 4 }
 0x146   : > { %v544_v36 = vsel %vm531_vm1, %v543_v30, %v522_v29  ;;  %v546_v41 = vsel %vm531_vm1, %v528_v28, %v545_v32 }
 0x147   : > { %v550_v43 = vperm.slane %v544_v36, %v2206_v33  ;;  %v554_v47 = vperm.slane %v546_v41, %v2206_v33 }
 0x149   : > { %v555_v57 = vrot.slane %v550_v43, 4  ;;  %v567_v0 = vrot.slane %v554_v47, 4 }
 0x14b   : > { %v817_v45 = vpop.permute.xlu1 %816 }
 0x14c   : > { %v839_v49 = vsel %vm531_vm1, %v838_v44, %v817_v45  ;;  %v840_v50 = vrot.slane %v817_v45, 4  ;;  %v525_v51 = vpop.permute.xlu0 %524 }
 0x14d   : > { %v845_v53 = vperm.slane %v839_v49, %v2206_v33  ;;  %v530_v54 = vrot.slane %v525_v51, 4  ;;  %v534_v55 = vsel %vm531_vm1, %v525_v51, %v533_v46 }
 0x14e   : > { %v841_v58 = vsel %vm531_vm1, %v823_v37, %v840_v50  ;;  %v542_v59 = vperm.slane %v534_v55, %v2206_v33 }
 0x14f   : > { %v849_v60 = vperm.slane %v841_v58, %v2206_v33  ;;  %v850_v61 = vrot.slane %v845_v53, 4  ;;  %v853_v62 = vsel %vm531_vm1, %v845_v53, %v852_v52  ;;  %v532_v63 = vsel %vm531_vm1, %v530_v54, %v2196_v13 }
 0x150   : > { %v861_v1 = vperm.slane %v853_v62, %v2217_v48  ;;  %v538_v2 = vperm.slane %v532_v63, %v2206_v33  ;;  %v569_v3 = vrot.slane %v542_v59, 4  ;;  %v568_v9 = vsel %vm531_vm1, %v567_v0, %v542_v59 }
 0x151   : > { %v851_v4 = vsel %vm531_vm1, %v850_v61, %v833_v40  ;;  %v862_v5 = vrot.slane %v849_v60, 4  ;;  %v865_v6 = vsel %vm531_vm1, %v849_v60, %v864_v56  ;;  %v574_v19 = vperm.slane %v568_v9, %v2217_v48 }
 0x152   : > { %v873_v7 = vperm.slane %v865_v6, %v2217_v48  ;;  %v556_v8 = vsel %vm531_vm1, %v555_v57, %v538_v2  ;;  %v857_v10 = vperm.slane %v851_v4, %v2217_v48  ;;  %v557_v12 = vrot.slane %v538_v2, 4 }
 0x153   : > { %v863_v11 = vsel %vm531_vm1, %v862_v5, %v837_v42  ;;  %v570_v13 = vsel %vm531_vm1, %v554_v47, %v569_v3  ;;  %v876_v14 = vrot.slane %v861_v1, 4  ;;  %v562_v16 = vperm.slane %v556_v8, %v2217_v48 }
 0x154   : > { %v558_v15 = vsel %vm531_vm1, %v550_v43, %v557_v12  ;;  %v869_v17 = vperm.slane %v863_v11, %v2217_v48  ;;  %v880_v18 = vrot.slane %v873_v7, 4  ;;  %v578_v20 = vperm.slane %v570_v13, %v2217_v48 }
 0x155   : > { %v874_v21 = vrot.slane %v857_v10, 4  ;;  %v566_v23 = vperm.slane %v558_v15, %v2217_v48  ;;  %v877_v24 = vsel %vm531_vm1, 0.0, %v876_v14  ;;  %v882_v25 = vsel %vm531_vm1, %v876_v14, %v857_v10 }
 0x156   : > { %v579_v26 = vrot.slane %v562_v16, 4  ;;  %v878_v28 = vrot.slane %v869_v17, 4  ;;  %v881_v29 = vsel %vm531_vm1, 0.0, %v880_v18  ;;  %v583_v30 = vrot.slane %v574_v19, 4 }
 0x157   : > { %v581_v27 = vrot.slane %v566_v23, 4  ;;  %v585_v31 = vrot.slane %v578_v20, 4  ;;  %v875_v32 = vsel %vm531_vm1, 0.0, %v874_v21  ;;  %v887_v34 = vrot.slane %v877_v24, 4 }
 0x158   : > { %v898_v41 = vrot.slane %v881_v29, 4  ;;  %v580_v42 = vsel %vm531_vm1, 0.0, %v579_v26  ;;  %v879_v45 = vsel %vm531_vm1, 0.0, %v878_v28  ;;  %v584_v46 = vsel %vm531_vm1, 0.0, %v583_v30 }
 0x159   : > { %v582_v35 = vsel %vm531_vm1, 0.0, %v581_v27  ;;  %v587_v36 = vsel %vm531_vm1, %v581_v27, %v562_v16  ;;  %v586_v37 = vsel %vm531_vm1, 0.0, %v585_v31  ;;  %v598_v40 = vsel %vm531_vm1, %v585_v31, %v574_v19 }
 0x15a   : > { %v591_v38 = vperm.slane %v587_v36, %v2206_v33  ;;  %v592_v39 = vrot.slane %v582_v35, 4  ;;  %v602_v43 = vperm.slane %v598_v40, %v2206_v33  ;;  %v603_v44 = vrot.slane %v586_v37, 4 }
 0x15b   : > { %v893_v50 = vsel %vm531_vm1, %v880_v18, %v869_v17  ;;  %v888_v54 = vsel %vm531_vm1, %v887_v34, %v875_v32  ;;  %v886_v56 = vperm.slane %v882_v25, %v2206_v33  ;;  %v899_v57 = vsel %vm531_vm1, %v898_v41, %v879_v45 }
 0x15c   : > { %v593_v47 = vsel %vm531_vm1, %v592_v39, %v580_v42  ;;  %v611_v49 = vrot.slane %v591_v38, 4  ;;  %v604_v52 = vsel %vm531_vm1, %v603_v44, %v584_v46  ;;  %v623_v53 = vrot.slane %v602_v43, 4 }
 0x15d   : > { %v597_v51 = vperm.slane %v593_v47, %v2206_v33  ;;  %v608_v55 = vperm.slane %v604_v52, %v2206_v33  ;;  %v897_v60 = vperm.slane %v893_v50, %v2206_v33  ;;  %v892_v0 = vperm.slane %v888_v54, %v2206_v33  ;;  %v649_v54 = vpop.permute.xlu2 %648 }
 0x15e   : > { %v903_v6 = vperm.slane %v899_v57, %v2206_v33  ;;  %v906_v7 = vrot.slane %v886_v56, 4  ;;  %v646_v57 = vpop.permute.xlu1 %645 }
 0x15f   : > { %v609_v58 = vrot.slane %v597_v51, 4  ;;  %v612_v59 = vsel %vm531_vm1, %v597_v51, %v611_v49  ;;  %v621_v62 = vrot.slane %v608_v55, 4  ;;  %v624_v63 = vsel %vm531_vm1, %v608_v55, %v623_v53 }
 0x160   : > { %v620_v61 = vperm.slane %v612_v59, %v2217_v48  ;;  %v632_v2 = vperm.slane %v624_v63, %v2217_v48  ;;  %v918_v12 = vrot.slane %v897_v60, 4  ;;  %v904_v16 = vrot.slane %v892_v0, 4 }
 0x161   : > { %v610_v1 = vsel %vm531_vm1, %v609_v58, %v591_v38  ;;  %v622_v4 = vsel %vm531_vm1, %v621_v62, %v602_v43  ;;  %v916_v19 = vrot.slane %v903_v6, 4  ;;  %v907_v23 = vsel %vm531_vm1, %v892_v0, %v906_v7  ;;  %v643_v58 = vpop.permute.xlu0 %642 }
 0x162   : > { %v616_v3 = vperm.slane %v610_v1, %v2217_v48  ;;  %v639_v5 = vrot.slane %v620_v61, 4  ;;  %v628_v8 = vperm.slane %v622_v4, %v2217_v48  ;;  %v637_v9 = vrot.slane %v632_v2, 4 }
 0x163   : > { %v919_v25 = vsel %vm531_vm1, %v903_v6, %v918_v12  ;;  %v905_v26 = vsel %vm531_vm1, %v904_v16, %v886_v56  ;;  %v915_v27 = vperm.slane %v907_v23, %v2217_v48  ;;  %v917_v28 = vsel %vm531_vm1, %v916_v19, %v897_v60 }
 0x164   : > { %v635_v10 = vrot.slane %v616_v3, 4  ;;  %v640_v11 = vsel %vm531_vm1, %v632_v2, %v639_v5  ;;  %v633_v13 = vrot.slane %v628_v8, 4  ;;  %v638_v14 = vsel %vm531_vm1, %v637_v9, %v620_v61 }
 0x165   : > { %v764_v15 = vpack.c.bf16 %v640_v11, %v640_v11  ;;  %v763_v18 = vpack.c.bf16 %v638_v14, %v638_v14  ;;  %v927_v29 = vperm.slane %v919_v25, %v2217_v48  ;;  %v911_v30 = vperm.slane %v905_v26, %v2217_v48 }
 0x166   : > { %v636_v17 = vsel %vm531_vm1, %v628_v8, %v635_v10  ;;  %v634_v20 = vsel %vm531_vm1, %v633_v13, %v616_v3  ;;  %v923_v31 = vperm.slane %v917_v28, %v2217_v48  ;;  %v934_v34 = vrot.slane %v915_v27, 4 }
 0x167   : > { %v762_v21 = vpack.c.bf16 %v636_v17, %v636_v17  ;;  %769 = vst.msk [vmem:[#allocation2 + $0xc] sm:$0xf] %vm765_vm2, %v764_v15  ;;  %v761_v24 = vpack.c.bf16 %v634_v20, %v634_v20  ;;  %v932_v37 = vrot.slane %v927_v29, 4  ;;  %v930_v40 = vrot.slane %v911_v30, 4 }
 0x168   : > { %768 = vst.msk [vmem:[#allocation2 + $0x8] sm:$0xf] %vm765_vm2, %v763_v18  ;;  %v928_v43 = vrot.slane %v923_v31, 4  ;;  %v935_v45 = vsel %vm531_vm1, %v927_v29, %v934_v34  ;;  %v653_v55 = vrot.slane %v2201_v22, 4  ;;  %v663_v56 = vrot.slane %v649_v54, 4 }
 0x169   : > { %767 = vst.msk [vmem:[#allocation2 + $0x4] sm:$0xf] %vm765_vm2, %v762_v21  ;;  %v933_v46 = vsel %vm531_vm1, %v932_v37, %v915_v27  ;;  %v931_v47 = vsel %vm531_vm1, %v923_v31, %v930_v40  ;;  %v939_v50 = vpack.c.bf16 %v935_v45, %v935_v45  ;;  %v651_v59 = vrot.slane %v646_v57, 4 }
 0x16a   : > { %766 = vst.msk [vmem:[#allocation2] sm:$0xf] %vm765_vm2, %v761_v24  ;;  %v929_v49 = vsel %vm531_vm1, %v928_v43, %v911_v30  ;;  %v938_v51 = vpack.c.bf16 %v933_v46, %v933_v46  ;;  %v937_v52 = vpack.c.bf16 %v931_v47, %v931_v47  ;;  %v654_v60 = vsel %vm531_vm1, %v646_v57, %v653_v55 }
 0x16b   : > { %v936_v53 = vpack.c.bf16 %v929_v49, %v929_v49  ;;  %v665_v61 = vrot.slane %v643_v58, 4  ;;  %v664_v62 = vsel %vm531_vm1, %v663_v56, %v643_v58  ;;  %v662_v63 = vperm.slane %v654_v60, %v2206_v33 }
 0x16c   : > { %v670_v0 = vperm.slane %v664_v62, %v2206_v33  ;;  %v652_v1 = vsel %vm531_vm1, %v651_v59, %v2201_v22 }
 0x16d   : > { %v666_v2 = vsel %vm531_vm1, %v649_v54, %v665_v61  ;;  %v658_v3 = vperm.slane %v652_v1, %v2206_v33  ;;  %v689_v4 = vrot.slane %v662_v63, 4 }
 0x16e   : > { %v943_v32 = vld [vmem:[#allocation2 + $0xc] sm:$0xf]  ;;  %v674_v5 = vperm.slane %v666_v2, %v2206_v33  ;;  %v675_v6 = vrot.slane %v670_v0, 4 }
 0x16f   : > { %v942_v35 = vld [vmem:[#allocation2 + $0x8] sm:$0xf]  ;;  %v1010_v36 = vsel %vm948_vm3, %v943_v32, 0  ;;  %v677_v7 = vrot.slane %v658_v3, 4 }
 0x170   : > { %v991_v38 = vsel %vm948_vm3, %v942_v35, 0  ;;  %1019 = vmatpush.bf16.xpose.msrb.mxu2 %v1010_v36  ;;  %v941_v39 = vld [vmem:[#allocation2 + $0x4] sm:$0xf]  ;;  %v676_v8 = vsel %vm531_vm1, %v675_v6, %v658_v3  ;;  %v687_v9 = vrot.slane %v674_v5, 4  ;;  %v690_v10 = vsel %vm531_vm1, %v674_v5, %v689_v4  ;;  %v1644_v5 = vld [vmem:[%s387_s21] ss:$0 sm:$0xff] }
 0x171   : > { %1000 = vmatpush.bf16.xpose.msrb.mxu1 %v991_v38  ;;  %v940_v41 = vld [vmem:[#allocation2] sm:$0xf]  ;;  %v972_v42 = vsel %vm948_vm3, %v941_v39, 0  ;;  %v682_v11 = vperm.slane %v676_v8, %v2217_v48  ;;  %v698_v12 = vperm.slane %v690_v10, %v2217_v48  ;;  %v678_v22 = vsel %vm531_vm1, %v670_v0, %v677_v7 }
 0x172   : > { %v953_v44 = vsel %vm948_vm3, %v940_v41, 0  ;;  %981 = vmatpush.bf16.xpose.msrb.mxu0 %v972_v42  ;;  %v688_v13 = vsel %vm531_vm1, %v687_v9, %v662_v63  ;;  %v686_v14 = vperm.slane %v678_v22, %v2217_v48 }
 0x173   : > { %962 = vmatpush.bf16.xpose.msra.mxu3 %v953_v44  ;;  %v694_v15 = vperm.slane %v688_v13, %v2217_v48  ;;  %v699_v16 = vrot.slane %v682_v11, 4  ;;  %v705_v17 = vrot.slane %v698_v12, 4 }
 0x174   : > { %v701_v18 = vrot.slane %v686_v14, 4 }
 0x175   : > { %v703_v19 = vrot.slane %v694_v15, 4  ;;  %v706_v20 = vsel %vm531_vm1, 0.0, %v705_v17  ;;  %v700_v21 = vsel %vm531_vm1, 0.0, %v699_v16  ;;  %v718_v23 = vsel %vm531_vm1, %v705_v17, %v694_v15 }
 0x176   : > { %v723_v24 = vrot.slane %v706_v20, 4  ;;  %v702_v25 = vsel %vm531_vm1, 0.0, %v701_v18  ;;  %v707_v27 = vsel %vm531_vm1, %v701_v18, %v682_v11  ;;  %v722_v28 = vperm.slane %v718_v23, %v2206_v33 }
 0x177   : > { %1506 = vmatmul.msk.bf16.vlgmr.msrb.gmra.mxu2 %vm948_vm3, %v939_v50  ;;  %v704_v26 = vsel %vm531_vm1, 0.0, %v703_v19  ;;  %v711_v29 = vperm.slane %v707_v27, %v2206_v33  ;;  %v712_v30 = vrot.slane %v702_v25, 4 }
 0x178   : > { %1505 = vmatmul.msk.bf16.vlgmr.msrb.gmra.mxu1 %vm948_vm3, %v938_v51  ;;  %v724_v31 = vsel %vm531_vm1, %v723_v24, %v704_v26  ;;  %v743_v34 = vrot.slane %v722_v28, 4 }
 0x179   : > { %1504 = vmatmul.msk.bf16.vlgmr.msrb.gmra.mxu0 %vm948_vm3, %v937_v52  ;;  %v728_v32 = vperm.slane %v724_v31, %v2206_v33  ;;  %v713_v35 = vsel %vm531_vm1, %v712_v30, %v700_v21  ;;  %v731_v36 = vrot.slane %v711_v29, 4 }
 0x17a   : > { %1503 = vmatmul.msk.bf16.vlgmr.msra.gmra.mxu3 %vm948_vm3, %v936_v53  ;;  %v717_v37 = vperm.slane %v713_v35, %v2206_v33 }
 0x17b   : > { %v741_v38 = vrot.slane %v728_v32, 4  ;;  %v744_v39 = vsel %vm531_vm1, %v728_v32, %v743_v34 }
 0x17c   : > { %v752_v40 = vperm.slane %v744_v39, %v2217_v48  ;;  %v729_v41 = vrot.slane %v717_v37, 4  ;;  %v732_v42 = vsel %vm531_vm1, %v717_v37, %v731_v36 }
 0x17d   : > { %v742_v43 = vsel %vm531_vm1, %v741_v38, %v722_v28  ;;  %v740_v44 = vperm.slane %v732_v42, %v2217_v48 }
 0x17e   : > { %v748_v45 = vperm.slane %v742_v43, %v2217_v48  ;;  %v757_v46 = vrot.slane %v752_v40, 4  ;;  %v730_v47 = vsel %vm531_vm1, %v729_v41, %v711_v29 }
 0x17f   : > { %v736_v49 = vperm.slane %v730_v47, %v2217_v48  ;;  %v759_v52 = vrot.slane %v740_v44, 4 }
 0x180   : > { %v753_v50 = vrot.slane %v748_v45, 4  ;;  %v758_v51 = vsel %vm531_vm1, %v757_v46, %v740_v44 }
 0x181   : > { %v772_v53 = vpack.c.bf16 %v758_v51, %v758_v51  ;;  %v755_v55 = vrot.slane %v736_v49, 4  ;;  %v760_v56 = vsel %vm531_vm1, %v752_v40, %v759_v52 }
 0x182   : > { %v754_v54 = vsel %vm531_vm1, %v753_v50, %v736_v49  ;;  %v773_v58 = vpack.c.bf16 %v760_v56, %v760_v56 }
 0x183   : > { %v770_v57 = vpack.c.bf16 %v754_v54, %v754_v54  ;;  %776 = vst.msk [vmem:[#allocation3 + $0x8] sm:$0xf] %vm765_vm2, %v772_v53  ;;  %v756_v59 = vsel %vm531_vm1, %v748_v45, %v755_v55 }
 0x184   : > { %v771_v60 = vpack.c.bf16 %v756_v59, %v756_v59  ;;  %777 = vst.msk [vmem:[#allocation3 + $0xc] sm:$0xf] %vm765_vm2, %v773_v58 }
 0x185   : > { %774 = vst.msk [vmem:[#allocation3] sm:$0xf] %vm765_vm2, %v770_v57 }
 0x186   : > { %775 = vst.msk [vmem:[#allocation3 + $0x4] sm:$0xf] %vm765_vm2, %v771_v60 }
 0x18a   : > { %v1067_v0 = vld [vmem:[#allocation3 + $0x8] sm:$0xf] }
 0x18b   : > { %v1112_v2 = vsel %vm1072_vm4, %v1067_v0, 0  ;;  %v1068_v3 = vld [vmem:[#allocation3 + $0xc] sm:$0xf] }
 0x18c   : > { %v1065_v61 = vld [vmem:[#allocation3] sm:$0xf]  ;;  %1121 = vmatpush.bf16.msra.mxu1 %v1112_v2  ;;  %v1131_v4 = vsel %vm1072_vm4, %v1068_v3, 0 }
 0x18d   : > { %v1074_v62 = vsel %vm1072_vm4, %v1065_v61, 0  ;;  %v1066_v63 = vld [vmem:[#allocation3 + $0x4] sm:$0xf]  ;;  %1140 = vmatpush.bf16.msra.mxu2 %v1131_v4 }
 0x18e   : > { %1083 = vmatpush.bf16.msrb.mxu3 %v1074_v62  ;;  %v1093_v1 = vsel %vm1072_vm4, %v1066_v63, 0 }
 0x18f   : > { %1102 = vmatpush.bf16.msra.mxu0 %v1093_v1 }
 0x1f5   : > { %v1002_v6 = vpop.f32.mrf.mxu1 }
 0x1f6   : > { %v1003_v7 = vadd.f32 %v1644_v5, %v1002_v6  ;;  %v983_v8 = vpop.f32.mrf.mxu0 }
 0x1f7   : > { %v984_v12 = vadd.f32 %v1644_v5, %v983_v8 }
 0x1f8   : > { %v1031_v9 = vsel %vm948_vm3, %v1003_v7, -inf }
 0x1f9   : > { %1032 = vmax.xlane.f32.xlu2 %v1031_v9  ;;  %v1028_v17 = vsel %vm948_vm3, %v984_v12, -inf }
 0x1fa   : > { %v1021_v10 = vpop.f32.mrf.mxu2 }
 0x1fb   : > { %v1022_v11 = vadd.f32 %v1644_v5, %v1021_v10 }
 0x1fd   : > { %v964_v22 = vpop.f32.mrf.mxu3  ;;  %v1004_v13 = vpop.f32.mrf.mxu1  ;;  %v1034_v14 = vsel %vm948_vm3, %v1022_v11, -inf }
 0x1fe   : > { %v965_v15 = vadd.f32 %v1644_v5, %v964_v22  ;;  %1035 = vmax.xlane.f32.xlu1 %v1034_v14  ;;  %v985_v16 = vpop.f32.mrf.mxu0 }
 0x200   : > { %v1025_v18 = vsel %vm948_vm3, %v965_v15, -inf }
 0x201   : > { %1029 = vmax.xlane.f32.xlu2 %v1028_v17  ;;  %1026 = vmax.xlane.f32.xlu0 %v1025_v18 }
 0x202   : > { %v1023_v19 = vpop.f32.mrf.mxu2 }
 0x205   : > { %v966_v20 = vpop.f32.mrf.mxu3 }
 0x26c   : > { %v1033_v21 = vpop.xlane.xlu2 %1032 }
 0x26d   : > { %v1039_v23 = vsub.f32 %v1003_v7, %v1033_v21 }
 0x26f   : > { %v1045_v24 = vmul.f32 1.442695, %v1039_v23 }
 0x271   : > { %1645 = vpow2.f32 %v1045_v24  ;;  %v1036_v25 = vpop.xlane.xlu1 %1035 }
 0x272   : > { %v1040_v26 = vsub.f32 %v1022_v11, %v1036_v25 }
 0x274   : > { %v1047_v27 = vmul.f32 1.442695, %v1040_v26  ;;  %v1030_v28 = vpop.xlane.xlu2 %1029  ;;  %v1027_v29 = vpop.xlane.xlu0 %1026 }
 0x275   : > { %v1038_v30 = vsub.f32 %v984_v12, %v1030_v28  ;;  %v1037_v31 = vsub.f32 %v965_v15, %v1027_v29 }
 0x276   : > { %1647 = vpow2.f32 %v1047_v27 }
 0x277   : > { %v1646_v32 = vpop.eup %1645  ;;  %v1043_v34 = vmul.f32 1.442695, %v1038_v30  ;;  %v1041_v35 = vmul.f32 1.442695, %v1037_v31 }
 0x278   : > { %v1063_v36 = vpack.c.bf16 %v1646_v32, %v1646_v32  ;;  %v1055_v37 = vsel %vm948_vm3, %v1646_v32, 0.0 }
 0x279   : > { %1649 = vpow2.f32 %v1043_v34  ;;  %1056 = vadd.xlane.f32.xlu0 %v1055_v37 }
 0x27a   : > { %1651 = vpow2.f32 %v1041_v35  ;;  %1509 = vmatmul.msk.bf16.vlgmr.msra.gmra.mxu1 %vm948_vm3, %v1063_v36 }
 0x27c   : > { %v1648_v38 = vpop.eup %1647 }
 0x27d   : > { %v1064_v39 = vpack.c.bf16 %v1648_v38, %v1648_v38  ;;  %v1058_v40 = vsel %vm948_vm3, %v1648_v38, 0.0 }
 0x27e   : > { %1059 = vadd.xlane.f32.xlu2 %v1058_v40 }
 0x27f   : > { %v1650_v41 = vpop.eup %1649  ;;  %1510 = vmatmul.msk.bf16.vlgmr.msra.gmra.mxu2 %vm948_vm3, %v1064_v39 }
 0x280   : > { %v1652_v42 = vpop.eup %1651  ;;  %v1062_v43 = vpack.c.bf16 %v1650_v41, %v1650_v41  ;;  %v1052_v44 = vsel %vm948_vm3, %v1650_v41, 0.0 }
 0x281   : > { %1053 = vadd.xlane.f32.xlu0 %v1052_v44  ;;  %v1049_v45 = vsel %vm948_vm3, %v1652_v42, 0.0  ;;  %v1061_v46 = vpack.c.bf16 %v1652_v42, %v1652_v42 }
 0x282   : > { %1050 = vadd.xlane.f32.xlu1 %v1049_v45  ;;  %1508 = vmatmul.msk.bf16.vlgmr.msra.gmra.mxu0 %vm948_vm3, %v1062_v43 }
 0x283   : > { %1507 = vmatmul.msk.bf16.vlgmr.msrb.gmra.mxu3 %vm948_vm3, %v1061_v46 }
 0x2ec   : > { %v1057_v47 = vpop.xlane.xlu0 %1056 }
 0x2f1   : > { %v1060_v51 = vpop.xlane.xlu2 %1059 }
 0x2f4   : > { %v1054_v49 = vpop.xlane.xlu0 %1053 }
 0x2f5   : > { %1653 = vrcp.f32 %v1054_v49  ;;  %v1051_v52 = vpop.xlane.xlu1 %1050 }
 0x2f6   : > { %1655 = vrcp.f32 %v1057_v47 }
 0x2f7   : > { %v1123_v50 = vpop.f32.mrf.mxu1  ;;  %1657 = vrcp.f32 %v1060_v51 }
 0x2f8   : > { %1659 = vrcp.f32 %v1051_v52 }
 0x2fb   : > { %v1654_v53 = vpop.eup %1653 }
 0x2fc   : > { %v1656_v57 = vpop.eup %1655 }
 0x2fd   : > { %v1658_v58 = vpop.eup %1657  ;;  %v1152_v60 = vmul.f32 %v1656_v57, %v1123_v50 }
 0x2fe   : > { %v1660_v1 = vpop.eup %1659 }
 0x2ff   : > { %v1104_v54 = vpop.f32.mrf.mxu0  ;;  %v1125_v55 = vpop.f32.mrf.mxu1  ;;  %v1154_v4 = vrot.slane %v1152_v60, 4 }
 0x300   : > { %v1151_v56 = vmul.f32 %v1654_v53, %v1104_v54 }
 0x302   : > { %v1142_v59 = vpop.f32.mrf.mxu2  ;;  %v1168_v61 = vrot.slane %v1151_v56, 4 }
 0x303   : > { %v1153_v62 = vmul.f32 %v1658_v58, %v1142_v59 }
 0x305   : > { %v1166_v63 = vrot.slane %v1153_v62, 4  ;;  %v1169_v0 = vsel %vm531_vm1, %v1153_v62, %v1168_v61 }
 0x306   : > { %v1085_v2 = vpop.f32.mrf.mxu3  ;;  %v1177_v3 = vperm.slane %v1169_v0, %v2206_v33 }
 0x307   : > { %v1150_v5 = vmul.f32 %v1660_v1, %v1085_v2  ;;  %v1167_v6 = vsel %vm531_vm1, %v1166_v63, %v1151_v56  ;;  %v1106_v7 = vpop.f32.mrf.mxu0 }
 0x308   : > { %v1173_v8 = vperm.slane %v1167_v6, %v2206_v33  ;;  %v1190_v22 = vrot.slane %v1177_v3, 4 }
 0x309   : > { %v1155_v9 = vsel %vm531_vm1, %v1154_v4, %v1150_v5  ;;  %v1156_v10 = vrot.slane %v1150_v5, 4 }
 0x30a   : > { %v1161_v11 = vperm.slane %v1155_v9, %v2206_v33  ;;  %v1178_v12 = vrot.slane %v1173_v8, 4  ;;  %v1144_v13 = vpop.f32.mrf.mxu2 }
 0x30b   : > { %v1157_v14 = vsel %vm531_vm1, %v1152_v60, %v1156_v10 }
 0x30c   : > { %v1165_v15 = vperm.slane %v1157_v14, %v2206_v33  ;;  %v1180_v16 = vrot.slane %v1161_v11, 4  ;;  %v1179_v17 = vsel %vm531_vm1, %v1178_v12, %v1161_v11 }
 0x30d   : > { %v1185_v18 = vperm.slane %v1179_v17, %v2217_v48 }
 0x30e   : > { %v1192_v19 = vrot.slane %v1165_v15, 4  ;;  %v1181_v20 = vsel %vm531_vm1, %v1173_v8, %v1180_v16  ;;  %v1191_v21 = vsel %vm531_vm1, %v1190_v22, %v1165_v15  ;;  %v1087_v23 = vpop.f32.mrf.mxu3 }
 0x30f   : > { %v1189_v24 = vperm.slane %v1181_v20, %v2217_v48  ;;  %v1197_v25 = vperm.slane %v1191_v21, %v2217_v48  ;;  %v1202_v26 = vrot.slane %v1185_v18, 4 }
 0x310   : > { %v1193_v27 = vsel %vm531_vm1, %v1177_v3, %v1192_v19 }
 0x311   : > { %v1201_v28 = vperm.slane %v1193_v27, %v2217_v48  ;;  %v1204_v29 = vrot.slane %v1189_v24, 4  ;;  %v1206_v30 = vrot.slane %v1197_v25, 4  ;;  %v1203_v34 = vsel %vm531_vm1, 0.0, %v1202_v26 }
 0x313   : > { %v1205_v31 = vsel %vm531_vm1, 0.0, %v1204_v29  ;;  %v1208_v32 = vrot.slane %v1201_v28, 4  ;;  %v1210_v35 = vsel %vm531_vm1, %v1204_v29, %v1185_v18  ;;  %v1207_v44 = vsel %vm531_vm1, 0.0, %v1206_v30 }
 0x314   : > { %v1215_v36 = vrot.slane %v1205_v31, 4  ;;  %v1214_v37 = vperm.slane %v1210_v35, %v2206_v33 }
 0x315   : > { %v1209_v38 = vsel %vm531_vm1, 0.0, %v1208_v32  ;;  %v1221_v39 = vsel %vm531_vm1, %v1208_v32, %v1197_v25 }
 0x316   : > { %v1226_v40 = vrot.slane %v1209_v38, 4  ;;  %v1216_v41 = vsel %vm531_vm1, %v1215_v36, %v1203_v34  ;;  %v1225_v42 = vperm.slane %v1221_v39, %v2206_v33  ;;  %v1234_v43 = vrot.slane %v1214_v37, 4 }
 0x317   : > { %v1220_v45 = vperm.slane %v1216_v41, %v2206_v33 }
 0x318   : > { %v1227_v46 = vsel %vm531_vm1, %v1226_v40, %v1207_v44  ;;  %v1246_v47 = vrot.slane %v1225_v42, 4 }
 0x319   : > { %v1231_v49 = vperm.slane %v1227_v46, %v2206_v33  ;;  %v1235_v50 = vsel %vm531_vm1, %v1220_v45, %v1234_v43  ;;  %v1232_v51 = vrot.slane %v1220_v45, 4 }
 0x31a   : > { %v1243_v52 = vperm.slane %v1235_v50, %v2217_v48 }
 0x31b   : > { %v1247_v53 = vsel %vm531_vm1, %v1231_v49, %v1246_v47  ;;  %v1233_v54 = vsel %vm531_vm1, %v1232_v51, %v1214_v37  ;;  %v1244_v55 = vrot.slane %v1231_v49, 4 }
 0x31c   : > { %v1255_v56 = vperm.slane %v1247_v53, %v2217_v48  ;;  %v1262_v57 = vrot.slane %v1243_v52, 4  ;;  %v1239_v58 = vperm.slane %v1233_v54, %v2217_v48 }
 0x31d   : > { %v1245_v59 = vsel %vm531_vm1, %v1244_v55, %v1225_v42 }
 0x31e   : > { %v1263_v33 = vsel %vm531_vm1, %v1255_v56, %v1262_v57  ;;  %v1260_v60 = vrot.slane %v1255_v56, 4  ;;  %v1251_v61 = vperm.slane %v1245_v59, %v2217_v48  ;;  %v1258_v62 = vrot.slane %v1239_v58, 4 }
 0x31f   : > { %1273 = vrot.lane.b32.xlu0 %v1263_v33, %s1978_s3 }
 0x320   : > { %v1261_v63 = vsel %vm531_vm1, %v1260_v60, %v1243_v52  ;;  %v1256_v0 = vrot.slane %v1251_v61, 4  ;;  %v1259_v1 = vsel %vm531_vm1, %v1251_v61, %v1258_v62 }
 0x321   : > { %1269 = vrot.lane.b32.xlu2 %v1261_v63, %s1979_s5  ;;  %1265 = vrot.lane.b32.xlu1 %v1259_v1, %s1980_s18 }
 0x322   : > { %v1257_v2 = vsel %vm531_vm1, %v1256_v0, %v1239_v58 }
 0x37b   : > { %v1270_v3 = vpop.permute.xlu2 %1269 }
 0x391   : > { %v1274_v5 = vpop.permute.xlu0 %1273 }
 0x393   : > { %v1266_v48 = vpop.permute.xlu1 %1265 }
 0x394   : > { %v1276_v4 = vsel %vm948_vm3, %v1257_v2, %v1266_v48 }
 0x395   : > { %v1278_v6 = vsel %vm1277_vm5, %v1276_v4, %v1270_v3 }
 0x396   : > { %v1280_v7 = vsel %vm1279_vm6, %v1278_v6, %v1274_v5 }
 0x397   : > { %1281 = vst.msk [vmem:[%s447_s8] sm:$0xff] %vm473_vm0, %v1280_v7 }
 0x398   : > { %1898 = shalt.err (!%p1895_p11)
}
 0x399   : > { %1543 = dma.vmem_to_hbm [thread:$0]  (%p2109_p2), %s1297_s1, 128, %s1299_s24, %s1283_s27  }
 0x39a PF: > { %s2486_s14 = sld [smem:[#allocation22_spill]] }
 0x39b   : > { %s2488_s17 = sld [smem:[#allocation24_spill]] }
 0x3a0   : > { %s1310_s21 = sand.u32 1, %s2486_s14  }
 0x3a1   : > { %p2489_p12 = scmp.ge.s32.totalorder %s2488_s17, 2  ;;  %s1311_s30 = scalar_lea.sflag [#allocation6], %s1310_s21 }
 0x3a3   : > { %p1569_p13 = pnand %p2489_p12, %p2116_p7 }
 0x3a5   : > { %p1570_p0 = pneg %p1569_p13 }
 0x3a7   : > { %1940 = dma.done.wait (%p1570_p0), %s1311_s30, 128  }
 0x3a8   : > { %1942 = vsyncadd (%p1570_p0), %s1311_s30, 4294967168  ;;  %s28_s29 = sadd.s32 1, %s2488_s17   ;;  %s2490_s12 = sld [smem:[#allocation23_spill]] }
 0x3a9   : > { %p25_p4 = scmp.ge.s32.totalorder %s28_s29, 4   ;;  %s2491_s26 = sld [smem:[#allocation26_spill]] }
 0x3aa   : > { %s2492_s13 = sld [smem:[#allocation25_spill]]  ;;  %s2493_s24 = smov %s1949_s25 }
 0x3ab   : > { %s2495_s27 = smov %s1961_s28 }
 0x3ac   :  { %27 = sbr.rel (!%p25_p4) target bundleno = 16 (0x10), region = 137 }
 0x3ae   : > { %s2494_s25 = smov %s2490_s12 }
 0x3b0   : > { %s2496_s28 = smov %s2492_s13 }
 0x3b1   :  { %1317 = vsyncpa [#allocation5], 1 }
 0x3b2   :  { %1319 = vsyncpa [#allocation5 + $0x1], 1 }
 0x3b3   :  { %1320 = vsyncpa [#allocation8], 1 }
 0x3b4   :  { %1322 = vsyncpa [#allocation8 + $0x1], 1 }
 0x3b5   :  { %1323 = vsyncpa [#allocation11], 1 }
 0x3b6   :  { %1324 = vsyncpa [#allocation14], 1 }
 0x3b7   :  { %1325 = vsyncpa [#allocation6], 1 }
 0x3b8   :  { %1327 = vsyncpa [#allocation6 + $0x1], 1 }

</bundles_post_ra>
